<compile_context>
chip_gen: v7x
topology: tpu7x:2x2x1
jax: 0.10.0
libtpu: 0.0.40
codegen_flags: <defaults>
</compile_context>

<pallas_src>
import functools

import jax
import jax.numpy as jnp
import numpy as np
from jax.experimental import pallas as pl
from jax.experimental.pallas import tpu as pltpu


# --------------- kernel 1: fused dual 3x3 conv + BN + ReLU --------------------

def _conv3x3_pair_kernel(x_ref, w_ref, s_ref, b_ref, o_ref, *, H, W):
    """Both 3x3 convs (weights stacked on output channels) + folded BN + ReLU.

    x_ref: (1, Cin, N)    bf16  flattened spatial, NO pre-padding
    w_ref: (C2, 9*Cin)    bf16  tap-major stacked conv5c / conv5c2 weights
    s_ref: (C2, 1) f32 BN scale       b_ref: (C2, 1) f32 BN bias
    o_ref: (1, C2, N)     bf16  lane-dense output
    """
    cin = x_ref.shape[1]
    n = H * W
    x = x_ref[0]                                                # (Cin, N) bf16

    # Column masks handle the horizontal halo of the flattened layout: a tap
    # with dw=-1 that wraps at column 0 would read (row-1, W-1), so that source
    # column is zeroed (and symmetrically for dw=+1).  Vertical halo is handled
    # by the lane zero-pad below.  All in-VMEM; nothing extra touches HBM.
    col = jax.lax.broadcasted_iota(jnp.int32, (1, n), 1) % W
    srcs = {
        -1: jnp.where(col != (W - 1), x, jnp.zeros_like(x)),   # taps with dw=-1
        0: x,
        1: jnp.where(col != 0, x, jnp.zeros_like(x)),          # taps with dw=+1
    }
    pad = W + 1
    zpad = jnp.zeros((cin, pad), x.dtype)
    padded = {d: jnp.concatenate([zpad, v, zpad], axis=1) for d, v in srcs.items()}

    # Stack the nine shifted windows on the contraction axis -> one deep matmul.
    taps = []
    for dh in (-1, 0, 1):
        for dw in (-1, 0, 1):
            start = pad + dh * W + dw
            taps.append(padded[dw][:, start:start + n])
    stacked = jnp.concatenate(taps, axis=0)                     # (9*Cin, N) bf16

    acc = jnp.dot(w_ref[...], stacked, preferred_element_type=jnp.float32)
    y = acc * s_ref[...] + b_ref[...]
    o_ref[0] = jnp.maximum(y, 0.0).astype(o_ref.dtype)


def conv3x3_pair_bn_relu(xf, w9, scale, bias, *, H, W):
    # xf: (B, Cin, H*W) bf16 -> (B, C2, H*W) bf16
    B, Cin, N = xf.shape
    C2 = w9.shape[0]
    return pl.pallas_call(
        functools.partial(_conv3x3_pair_kernel, H=H, W=W),
        out_shape=jax.ShapeDtypeStruct((B, C2, N), jnp.bfloat16),
        grid=(B,),
        in_specs=[
            pl.BlockSpec((1, Cin, N), lambda b: (b, 0, 0)),
            pl.BlockSpec((C2, 9 * Cin), lambda b: (0, 0)),
            pl.BlockSpec((C2, 1), lambda b: (0, 0)),
            pl.BlockSpec((C2, 1), lambda b: (0, 0)),
        ],
        out_specs=pl.BlockSpec((1, C2, N), lambda b: (b, 0, 0)),
        compiler_params=pltpu.CompilerParams(
            dimension_semantics=("parallel",),
            vmem_limit_bytes=64 * 1024 * 1024),
    )(xf, w9, scale, bias)


# --------------- kernel 2: fused dual CAM + conv5e + SE head ------------------

def _cam_head_kernel(f_ref, g_ref, w5e_ref, s5e_ref, b5e_ref,
                     fcw_ref, fcb_ref, c8w_ref, c8b_ref, sew_ref, seb_ref,
                     o1_ref, o2_ref):
    """Per-batch fused: CAM x2 -> conv5e+BN+ReLU -> sum -> GAP/fc gate -> conv8/se.

    f_ref : (1, 2C, N) bf16  branch-1 rows [0, C), branch-2 rows [C, 2C)
    g_ref : (2,) f32 in SMEM (CAM gammas)
    w5e   : (C, C) bf16     s5e/b5e: (C, 1) f32
    fcw   : (C, C) f32      fcb: (C, 1) f32
    c8w   : (Cop, C) bf16   c8b: (Cop, 1) f32   (Cop = Co padded to 8 sublanes)
    sew   : (Cop, C) f32    seb: (Cop, 1) f32
    o1    : (1, Cop, N) bf16     o2: (1, Cop, 1) f32
    """
    C = w5e_ref.shape[0]
    w5e = w5e_ref[...]
    s5e = s5e_ref[...]
    b5e = b5e_ref[...]

    def cam_branch(f, gamma):
        # f: (C, N) bf16.  Energy / attn matmuls feed the MXU in bf16 with f32
        # accumulation; softmax math stays f32.
        # TODO(synk): if the bundle dump shows a materialized (N,C) relayout for
        # this dot_general, pre-transpose a bf16 copy of f once per branch.
        energy = jax.lax.dot_general(f, f, (((1,), (1,)), ((), ())),
                                     preferred_element_type=jnp.float32)   # (C, C)
        en = jnp.max(energy, axis=-1, keepdims=True) - energy
        e = jnp.exp(en - jnp.max(en, axis=-1, keepdims=True))
        attn = e * pl.reciprocal(jnp.sum(e, axis=-1, keepdims=True), approx=True)
        cam = jnp.dot(attn.astype(jnp.bfloat16), f,
                      preferred_element_type=jnp.float32)                  # (C, N)
        cam = gamma * cam + f.astype(jnp.float32)
        # conv5e: 1x1 conv (bf16 MXU inputs, f32 accumulate) + BN + ReLU.
        y = jnp.dot(w5e, cam.astype(jnp.bfloat16),
                    preferred_element_type=jnp.float32)
        return jnp.maximum(y * s5e + b5e, 0.0)

    # NOTE: the reference PyTorch forward applies conv5e (not conv5e2) to BOTH
    # branches; replicated faithfully here.
    s1 = cam_branch(f_ref[0, 0:C, :], g_ref[0])
    s2 = cam_branch(f_ref[0, C:2 * C, :], g_ref[1])
    fsum = s1 + s2                                                         # (C, N)
    gap = jnp.mean(fsum, axis=-1, keepdims=True)                           # (C, 1)
    gate = jax.nn.sigmoid(
        jnp.dot(fcw_ref[...], gap, preferred_element_type=jnp.float32)
        + fcb_ref[...])                                                    # (C, 1)
    y = jnp.maximum(fsum + fsum * gate, 0.0)
    # conv8: Dropout2d(0.1) is identity in eval mode, then 1x1 conv with bias.
    o1_ref[0] = (jnp.dot(c8w_ref[...], y.astype(jnp.bfloat16),
                         preferred_element_type=jnp.float32)
                 + c8b_ref[...]).astype(o1_ref.dtype)
    # selayer: Linear(inter_channels, out_channels) on the squeezed GAP feature.
    o2_ref[0] = (jnp.dot(sew_ref[...], gap, preferred_element_type=jnp.float32)
                 + seb_ref[...]).astype(o2_ref.dtype)


def cam_head(feat, gammas, w5e, s5e, b5e, fcw, fcb, c8w, c8b, sew, seb):
    B, C2, N = feat.shape
    C = C2 // 2
    Cop = c8w.shape[0]
    return pl.pallas_call(
        _cam_head_kernel,
        out_shape=(jax.ShapeDtypeStruct((B, Cop, N), jnp.bfloat16),
                   jax.ShapeDtypeStruct((B, Cop, 1), jnp.float32)),
        grid=(B,),
        in_specs=[
            pl.BlockSpec((1, C2, N), lambda b: (b, 0, 0)),
            pl.BlockSpec(memory_space=pltpu.MemorySpace.SMEM),   # gammas (2,)
            pl.BlockSpec((C, C), lambda b: (0, 0)),
            pl.BlockSpec((C, 1), lambda b: (0, 0)),
            pl.BlockSpec((C, 1), lambda b: (0, 0)),
            pl.BlockSpec((C, C), lambda b: (0, 0)),
            pl.BlockSpec((C, 1), lambda b: (0, 0)),
            pl.BlockSpec((Cop, C), lambda b: (0, 0)),
            pl.BlockSpec((Cop, 1), lambda b: (0, 0)),
            pl.BlockSpec((Cop, C), lambda b: (0, 0)),
            pl.BlockSpec((Cop, 1), lambda b: (0, 0)),
        ],
        out_specs=(pl.BlockSpec((1, Cop, N), lambda b: (b, 0, 0)),
                   pl.BlockSpec((1, Cop, 1), lambda b: (b, 0, 0))),
        compiler_params=pltpu.CompilerParams(
            dimension_semantics=("parallel",),
            vmem_limit_bytes=64 * 1024 * 1024),
    )(feat, gammas, w5e, s5e, b5e, fcw, fcb, c8w, c8b, sew, seb)


# --------------------------- plain-JAX glue -----------------------------------

def cam2net_head_forward(x, p):
    """x: (B, Cin, H, W) NCHW (ideally bf16) -> (out1 (B, Co, H, W) bf16, out2 (B, Co) f32)."""
    B, Cin, H, W = x.shape
    N = H * W
    Ci = p['conv5e_w'].shape[0]
    C2 = 2 * Ci

    # --- stage 1: conv5c & conv5c2 (3x3, pad=1) + BN + ReLU, fused --------------
    # No pad / im2col / cast pass over x: the kernel handles the halo in-VMEM.
    xf = x.reshape(B, Cin, N).astype(jnp.bfloat16)   # no-op cast if x is bf16
    w = jnp.concatenate([p['conv5c_w'], p['conv5c2_w']], axis=0)     # (C2, Cin, 3, 3)
    w9 = jnp.transpose(w, (0, 2, 3, 1)).reshape(C2, 9 * Cin).astype(jnp.bfloat16)
    s = jnp.concatenate([p['bn5c_scale'], p['bn5c2_scale']], axis=0)
    b = jnp.concatenate([p['bn5c_bias'], p['bn5c2_bias']], axis=0)
    feat = conv3x3_pair_bn_relu(xf, w9, s, b, H=H, W=W)              # (B, 2Ci, N) bf16

    # --- stage 2: dual CAM + conv5e + SE head, fused per batch element ----------
    gammas = jnp.concatenate([p['gamma1'].reshape(-1), p['gamma2'].reshape(-1)])
    Co = p['conv8_w'].shape[0]
    Cop = -(-Co // 8) * 8                    # pad output channels to 8 sublanes

    def padr(a):
        return jnp.pad(a, ((0, Cop - Co), (0, 0)))

    out1p, out2p = cam_head(
        feat, gammas,
        p['conv5e_w'].astype(jnp.bfloat16), p['bn5e_scale'], p['bn5e_bias'],
        p['fc_w'], p['fc_b'],
        padr(p['conv8_w']).astype(jnp.bfloat16), padr(p['conv8_b']),
        padr(p['se_w']), padr(p['se_b']))
    out1 = out1p[:, :Co, :].reshape(B, Co, H, W)
    out2 = out2p[:, :Co, 0]
    return out1, out2


# --------------------------- parameters ---------------------------------------

def init_params(key, in_channels, out_channels):
    Ci = in_channels // 4
    keys = iter(jax.random.split(key, 24))

    def nrm(shape, sdev=0.1):
        return sdev * jax.random.normal(next(keys), shape, jnp.float32)

    def bf16r(a):
        # MXU-bound weights are kept bf16-representable so the f32 reference and
        # the bf16-fed kernels consume identical values.
        return a.astype(jnp.bfloat16).astype(jnp.float32)

    def bn(C):
        # BatchNorm2d (eval): fold (weight, bias, running_mean, running_var).
        w = 1.0 + nrm((C,))
        b = nrm((C,))
        m = nrm((C,))
        v = jnp.abs(nrm((C,))) + 0.5
        scale = w / jnp.sqrt(v + 1e-5)
        bias = b - m * scale
        return scale.reshape(C, 1), bias.reshape(C, 1)

    p = {}
    p['conv5c_w'] = bf16r(nrm((Ci, in_channels, 3, 3)))
    p['bn5c_scale'], p['bn5c_bias'] = bn(Ci)
    p['conv5c2_w'] = bf16r(nrm((Ci, in_channels, 3, 3)))
    p['bn5c2_scale'], p['bn5c2_bias'] = bn(Ci)
    p['conv5e_w'] = bf16r(nrm((Ci, Ci)))          # 1x1 conv weight, squeezed
    p['bn5e_scale'], p['bn5e_bias'] = bn(Ci)
    # CAM gammas are nn.Parameter(zeros(1)) in the reference; nonzero here so the
    # attention path actually contributes in this synthetic check.
    p['gamma1'] = jnp.full((1, 1), 0.3, jnp.float32)
    p['gamma2'] = jnp.full((1, 1), 0.7, jnp.float32)
    p['fc_w'] = nrm((Ci, Ci))
    p['fc_b'] = nrm((Ci, 1))
    # TODO(synk): reference conv8 hardcodes 512 input channels; built here with
    # inter_channels so it composes with feat_sum at small synthetic sizes.
    p['conv8_w'] = bf16r(nrm((out_channels, Ci)))
    p['conv8_b'] = nrm((out_channels, 1))
    p['se_w'] = nrm((out_channels, Ci))
    p['se_b'] = nrm((out_channels, 1))
    return p


# --------------------------- pure-JAX reference --------------------------------

def ref_forward(x, p):
    HI = jax.lax.Precision.HIGHEST

    def conv3(x, w):
        return jax.lax.conv_general_dilated(
            x, w, (1, 1), ((1, 1), (1, 1)),
            dimension_numbers=('NCHW', 'OIHW', 'NCHW'), precision=HI)

    def bn_relu(y, scale, bias):
        return jnp.maximum(y * scale[:, 0][None, :, None, None]
                           + bias[:, 0][None, :, None, None], 0.0)

    def cam(x, gamma):
        B, C, H, W = x.shape
        q = x.reshape(B, C, H * W)
        energy = jnp.matmul(q, q.transpose(0, 2, 1), precision=HI)
        en = jnp.max(energy, -1, keepdims=True) - energy
        attn = jax.nn.softmax(en, axis=-1)
        out = jnp.matmul(attn, q, precision=HI).reshape(B, C, H, W)
        return gamma * out + x

    def conv1(x, w):
        return jnp.einsum('oc,bchw->bohw', w, x, precision=HI)

    feat = bn_relu(conv3(x, p['conv5c_w']), p['bn5c_scale'], p['bn5c_bias'])
    sec_feat = bn_relu(conv1(cam(feat, p['gamma1'][0, 0]), p['conv5e_w']),
                       p['bn5e_scale'], p['bn5e_bias'])
    feat2 = bn_relu(conv3(x, p['conv5c2_w']), p['bn5c2_scale'], p['bn5c2_bias'])
    sec_feat2 = bn_relu(conv1(cam(feat2, p['gamma2'][0, 0]), p['conv5e_w']),
                        p['bn5e_scale'], p['bn5e_bias'])
    feat_sum = sec_feat + sec_feat2
    gap = jnp.mean(feat_sum, axis=(2, 3), keepdims=True)
    g = jax.nn.sigmoid(jnp.einsum('oc,bc->bo', p['fc_w'], gap[:, :, 0, 0],
                                  precision=HI) + p['fc_b'][:, 0][None, :])
    y = jnp.maximum(feat_sum + feat_sum * g[:, :, None, None], 0.0)
    out1 = (jnp.einsum('oc,bchw->bohw', p['conv8_w'], y, precision=HI)
            + p['conv8_b'][:, 0][None, :, None, None])
    out2 = (jnp.einsum('oc,bc->bo', p['se_w'], gap[:, :, 0, 0], precision=HI)
            + p['se_b'][:, 0][None, :])
    return out1, out2


# --------------------------- main ----------------------------------------------

if __name__ == "__main__":
    key = jax.random.PRNGKey(0)
    B, Cin, H, W = 2, 32, 16, 16       # inter_channels = Cin // 4 = 8
    Co = 6
    kx, kp = jax.random.split(key)
    x32 = 0.5 * jax.random.normal(kx, (B, Cin, H, W), jnp.float32)
    # backbone-style bf16 activations into the head; exact f32 copy for the ref
    x_bf = x32.astype(jnp.bfloat16)
    x32 = x_bf.astype(jnp.float32)
    params = init_params(kp, Cin, Co)

    out1, out2 = jax.jit(cam2net_head_forward)(x_bf, params)
    jax.block_until_ready((out1, out2))

    r1, r2 = ref_forward(x32, params)
    np.testing.assert_allclose(np.asarray(out1.astype(jnp.float32)), np.asarray(r1),
                               rtol=2e-2, atol=2e-2)
    np.testing.assert_allclose(np.asarray(out2), np.asarray(r2), rtol=2e-2, atol=2e-2)
    print("KERNEL_OK")
</pallas_src>

<mosaic_0001>
module attributes {stable_mosaic.version = 11 : i64} {
  func.func @_conv3x3_pair_kernel(%arg0: i32, %arg1: memref<1x32x256xbf16, #tpu.memory_space<vmem>>, %arg2: memref<16x288xbf16, #tpu.memory_space<vmem>>, %arg3: memref<16x1xf32, #tpu.memory_space<vmem>>, %arg4: memref<16x1xf32, #tpu.memory_space<vmem>>, %arg5: memref<1x16x256xbf16, #tpu.memory_space<vmem>>) attributes {dimension_semantics = [#tpu.dimension_semantics<parallel>], iteration_bounds = array<i64: 2>, scalar_prefetch = 0 : i64, scratch_operands = 0 : i64, tpu.core_type = #tpu.core_type<tc>, window_params = [{transform_indices = @transform_0, window_bounds = array<i64: 1, 32, 256>}, {pipeline_mode = #tpu.pipeline_mode<synchronous>, transform_indices = @transform_1, window_bounds = array<i64: 16, 288>}, {pipeline_mode = #tpu.pipeline_mode<synchronous>, transform_indices = @transform_2, window_bounds = array<i64: 16, 1>}, {pipeline_mode = #tpu.pipeline_mode<synchronous>, transform_indices = @transform_3, window_bounds = array<i64: 16, 1>}, {transform_indices = @transform_4, window_bounds = array<i64: 1, 16, 256>}]} {
    %c0 = arith.constant 0 : index
    %c0_0 = arith.constant 0 : index
    %c0_1 = arith.constant 0 : index
    %0 = vector.load %arg1[%c0, %c0_0, %c0_1] : memref<1x32x256xbf16, #tpu.memory_space<vmem>>, vector<1x32x256xbf16>
    %1 = vector.shape_cast %0 : vector<1x32x256xbf16> to vector<32x256xbf16>
    %2 = tpu.iota {dimensions = array<i32: 1>} : vector<1x256xi32>
    %c16_i32 = arith.constant 16 : i32
    %c0_i32 = arith.constant 0 : i32
    %3 = arith.cmpi eq, %c16_i32, %c0_i32 : i32
    %c1_i32 = arith.constant 1 : i32
    %4 = arith.select %3, %c1_i32, %c16_i32 : i32
    %5 = vector.broadcast %4 : i32 to vector<1x256xi32>
    %6 = arith.remsi %2, %5 : vector<1x256xi32>
    %c0_i32_2 = arith.constant 0 : i32
    %7 = vector.broadcast %c0_i32_2 : i32 to vector<1x256xi32>
    %8 = arith.cmpi ne, %6, %7 : vector<1x256xi32>
    %c0_i32_3 = arith.constant 0 : i32
    %9 = vector.broadcast %c0_i32_3 : i32 to vector<1x256xi32>
    %10 = arith.cmpi slt, %6, %9 : vector<1x256xi32>
    %c0_i32_4 = arith.constant 0 : i32
    %11 = arith.cmpi slt, %4, %c0_i32_4 : i32
    %12 = vector.broadcast %11 : i1 to vector<1x256xi1>
    %13 = vector.broadcast %12 : vector<1x256xi1> to vector<1x256xi1>
    %14 = arith.xori %10, %13 : vector<1x256xi1>
    %15 = arith.andi %14, %8 : vector<1x256xi1>
    %16 = vector.broadcast %4 : i32 to vector<1x256xi32>
    %17 = arith.addi %6, %16 : vector<1x256xi32>
    %18 = arith.select %15, %17, %6 : vector<1x256xi1>, vector<1x256xi32>
    %c15_i32 = arith.constant 15 : i32
    %19 = vector.broadcast %c15_i32 : i32 to vector<1x256xi32>
    %20 = arith.cmpi ne, %18, %19 : vector<1x256xi32>
    %cst = arith.constant 0.000000e+00 : bf16
    %21 = vector.broadcast %cst : bf16 to vector<32x256xbf16>
    %22 = vector.shape_cast %20 : vector<1x256xi1> to vector<1x256xi1>
    %23 = vector.broadcast %22 : vector<1x256xi1> to vector<32x256xi1>
    %24 = arith.select %23, %1, %21 : vector<32x256xi1>, vector<32x256xbf16>
    %c0_i32_5 = arith.constant 0 : i32
    %25 = vector.broadcast %c0_i32_5 : i32 to vector<1x256xi32>
    %26 = arith.cmpi ne, %18, %25 : vector<1x256xi32>
    %cst_6 = arith.constant 0.000000e+00 : bf16
    %27 = vector.broadcast %cst_6 : bf16 to vector<32x256xbf16>
    %28 = vector.shape_cast %26 : vector<1x256xi1> to vector<1x256xi1>
    %29 = vector.broadcast %28 : vector<1x256xi1> to vector<32x256xi1>
    %30 = arith.select %29, %1, %27 : vector<32x256xi1>, vector<32x256xbf16>
    %cst_7 = arith.constant 0.000000e+00 : bf16
    %31 = vector.broadcast %cst_7 : bf16 to vector<32x17xbf16>
    %32 = tpu.concatenate %31, %24, %31 in 1 : vector<32x17xbf16>, vector<32x256xbf16>, vector<32x17xbf16> -> vector<32x290xbf16>
    %33 = tpu.concatenate %31, %1, %31 in 1 : vector<32x17xbf16>, vector<32x256xbf16>, vector<32x17xbf16> -> vector<32x290xbf16>
    %34 = tpu.concatenate %31, %30, %31 in 1 : vector<32x17xbf16>, vector<32x256xbf16>, vector<32x17xbf16> -> vector<32x290xbf16>
    %35 = vector.extract_strided_slice %32 {offsets = [0, 0], sizes = [32, 256], strides = [1, 1]} : vector<32x290xbf16> to vector<32x256xbf16>
    %36 = vector.extract_strided_slice %33 {offsets = [0, 1], sizes = [32, 256], strides = [1, 1]} : vector<32x290xbf16> to vector<32x256xbf16>
    %37 = vector.extract_strided_slice %34 {offsets = [0, 2], sizes = [32, 256], strides = [1, 1]} : vector<32x290xbf16> to vector<32x256xbf16>
    %38 = vector.extract_strided_slice %32 {offsets = [0, 16], sizes = [32, 256], strides = [1, 1]} : vector<32x290xbf16> to vector<32x256xbf16>
    %39 = vector.extract_strided_slice %33 {offsets = [0, 17], sizes = [32, 256], strides = [1, 1]} : vector<32x290xbf16> to vector<32x256xbf16>
    %40 = vector.extract_strided_slice %34 {offsets = [0, 18], sizes = [32, 256], strides = [1, 1]} : vector<32x290xbf16> to vector<32x256xbf16>
    %41 = vector.extract_strided_slice %32 {offsets = [0, 32], sizes = [32, 256], strides = [1, 1]} : vector<32x290xbf16> to vector<32x256xbf16>
    %42 = vector.extract_strided_slice %33 {offsets = [0, 33], sizes = [32, 256], strides = [1, 1]} : vector<32x290xbf16> to vector<32x256xbf16>
    %43 = vector.extract_strided_slice %34 {offsets = [0, 34], sizes = [32, 256], strides = [1, 1]} : vector<32x290xbf16> to vector<32x256xbf16>
    %44 = tpu.concatenate %35, %36, %37, %38, %39, %40, %41, %42, %43 in 0 : vector<32x256xbf16>, vector<32x256xbf16>, vector<32x256xbf16>, vector<32x256xbf16>, vector<32x256xbf16>, vector<32x256xbf16>, vector<32x256xbf16>, vector<32x256xbf16>, vector<32x256xbf16> -> vector<288x256xbf16>
    %c0_8 = arith.constant 0 : index
    %c0_9 = arith.constant 0 : index
    %45 = vector.load %arg2[%c0_8, %c0_9] : memref<16x288xbf16, #tpu.memory_space<vmem>>, vector<16x288xbf16>
    %cst_10 = arith.constant dense<0.000000e+00> : vector<16x256xf32>
    %46 = tpu.matmul %45, %44, %cst_10 {dimension_numbers = #tpu.dot_dimension_numbers<[1], [0], [0], [1], [0, 0, 1, 1], [], []>} : vector<16x288xbf16>, vector<288x256xbf16>, vector<16x256xf32> -> vector<16x256xf32>
    %c0_11 = arith.constant 0 : index
    %c0_12 = arith.constant 0 : index
    %47 = vector.load %arg3[%c0_11, %c0_12] : memref<16x1xf32, #tpu.memory_space<vmem>>, vector<16x1xf32>
    %48 = vector.broadcast %47 : vector<16x1xf32> to vector<16x256xf32>
    %49 = arith.mulf %46, %48 : vector<16x256xf32>
    %c0_13 = arith.constant 0 : index
    %c0_14 = arith.constant 0 : index
    %50 = vector.load %arg4[%c0_13, %c0_14] : memref<16x1xf32, #tpu.memory_space<vmem>>, vector<16x1xf32>
    %51 = vector.broadcast %50 : vector<16x1xf32> to vector<16x256xf32>
    %52 = arith.addf %49, %51 : vector<16x256xf32>
    %cst_15 = arith.constant 0.000000e+00 : f32
    %53 = vector.broadcast %cst_15 : f32 to vector<16x256xf32>
    %54 = arith.maximumf %52, %53 : vector<16x256xf32>
    %55 = arith.truncf %54 : vector<16x256xf32> to vector<16x256xbf16>
    %c0_16 = arith.constant 0 : index
    %c0_17 = arith.constant 0 : index
    %c0_18 = arith.constant 0 : index
    %56 = vector.load %arg5[%c0_16, %c0_17, %c0_18] : memref<1x16x256xbf16, #tpu.memory_space<vmem>>, vector<1x16x256xbf16>
    %57 = vector.shape_cast %56 : vector<1x16x256xbf16> to vector<16x256xbf16>
    %58 = vector.shape_cast %55 : vector<16x256xbf16> to vector<1x16x256xbf16>
    tpu.vector_store %arg5[%c0_16, %c0_17, %c0_18], %58 {strides = array<i32>} : memref<1x16x256xbf16, #tpu.memory_space<vmem>>, vector<1x16x256xbf16>,
    return
  }
  func.func @transform_0(%arg0: i32) -> (i32, i32, i32) {
    %c0_i32 = arith.constant 0 : i32
    %c0_i32_0 = arith.constant 0 : i32
    %c0_i32_1 = arith.constant 0 : i32
    return %arg0, %c0_i32, %c0_i32_0 : i32, i32, i32
  }
  func.func @transform_1(%arg0: i32) -> (i32, i32) {
    %c0_i32 = arith.constant 0 : i32
    %c0_i32_0 = arith.constant 0 : i32
    %c0_i32_1 = arith.constant 0 : i32
    return %c0_i32, %c0_i32_0 : i32, i32
  }
  func.func @transform_2(%arg0: i32) -> (i32, i32) {
    %c0_i32 = arith.constant 0 : i32
    %c0_i32_0 = arith.constant 0 : i32
    %c0_i32_1 = arith.constant 0 : i32
    return %c0_i32, %c0_i32_0 : i32, i32
  }
  func.func @transform_3(%arg0: i32) -> (i32, i32) {
    %c0_i32 = arith.constant 0 : i32
    %c0_i32_0 = arith.constant 0 : i32
    %c0_i32_1 = arith.constant 0 : i32
    return %c0_i32, %c0_i32_0 : i32, i32
  }
  func.func @transform_4(%arg0: i32) -> (i32, i32, i32) {
    %c0_i32 = arith.constant 0 : i32
    %c0_i32_0 = arith.constant 0 : i32
    %c0_i32_1 = arith.constant 0 : i32
    return %arg0, %c0_i32, %c0_i32_0 : i32, i32, i32
  }
}

module attributes {stable_mosaic.version = 11 : i64} {
  func.func @_cam_head_kernel(%arg0: i32, %arg1: memref<1x16x256xbf16, #tpu.memory_space<vmem>>, %arg2: memref<2xf32, #tpu.memory_space<smem>>, %arg3: memref<8x8xbf16, #tpu.memory_space<vmem>>, %arg4: memref<8x1xf32, #tpu.memory_space<vmem>>, %arg5: memref<8x1xf32, #tpu.memory_space<vmem>>, %arg6: memref<8x8xf32, #tpu.memory_space<vmem>>, %arg7: memref<8x1xf32, #tpu.memory_space<vmem>>, %arg8: memref<8x8xbf16, #tpu.memory_space<vmem>>, %arg9: memref<8x1xf32, #tpu.memory_space<vmem>>, %arg10: memref<8x8xf32, #tpu.memory_space<vmem>>, %arg11: memref<8x1xf32, #tpu.memory_space<vmem>>, %arg12: memref<1x8x256xbf16, #tpu.memory_space<vmem>>, %arg13: memref<1x8x1xf32, #tpu.memory_space<vmem>>) attributes {dimension_semantics = [#tpu.dimension_semantics<parallel>], iteration_bounds = array<i64: 2>, scalar_prefetch = 0 : i64, scratch_operands = 0 : i64, tpu.core_type = #tpu.core_type<tc>, window_params = [{transform_indices = @transform_0, window_bounds = array<i64: 1, 16, 256>}, {transform_indices = @transform_1, window_bounds = array<i64: 2>}, {pipeline_mode = #tpu.pipeline_mode<synchronous>, transform_indices = @transform_2, window_bounds = array<i64: 8, 8>}, {pipeline_mode = #tpu.pipeline_mode<synchronous>, transform_indices = @transform_3, window_bounds = array<i64: 8, 1>}, {pipeline_mode = #tpu.pipeline_mode<synchronous>, transform_indices = @transform_4, window_bounds = array<i64: 8, 1>}, {pipeline_mode = #tpu.pipeline_mode<synchronous>, transform_indices = @transform_5, window_bounds = array<i64: 8, 8>}, {pipeline_mode = #tpu.pipeline_mode<synchronous>, transform_indices = @transform_6, window_bounds = array<i64: 8, 1>}, {pipeline_mode = #tpu.pipeline_mode<synchronous>, transform_indices = @transform_7, window_bounds = array<i64: 8, 8>}, {pipeline_mode = #tpu.pipeline_mode<synchronous>, transform_indices = @transform_8, window_bounds = array<i64: 8, 1>}, {pipeline_mode = #tpu.pipeline_mode<synchronous>, transform_indices = @transform_9, window_bounds = array<i64: 8, 8>}, {pipeline_mode = #tpu.pipeline_mode<synchronous>, transform_indices = @transform_10, window_bounds = array<i64: 8, 1>}, {transform_indices = @transform_11, window_bounds = array<i64: 1, 8, 256>}, {transform_indices = @transform_12, window_bounds = array<i64: 1, 8, 1>}]} {
    %c0 = arith.constant 0 : index
    %c0_0 = arith.constant 0 : index
    %0 = vector.load %arg3[%c0, %c0_0] : memref<8x8xbf16, #tpu.memory_space<vmem>>, vector<8x8xbf16>
    %c0_1 = arith.constant 0 : index
    %c0_2 = arith.constant 0 : index
    %1 = vector.load %arg4[%c0_1, %c0_2] : memref<8x1xf32, #tpu.memory_space<vmem>>, vector<8x1xf32>
    %c0_3 = arith.constant 0 : index
    %c0_4 = arith.constant 0 : index
    %2 = vector.load %arg5[%c0_3, %c0_4] : memref<8x1xf32, #tpu.memory_space<vmem>>, vector<8x1xf32>
    %c0_5 = arith.constant 0 : index
    %c0_6 = arith.constant 0 : index
    %c0_7 = arith.constant 0 : index
    %3 = vector.load %arg1[%c0_5, %c0_6, %c0_7] : memref<1x16x256xbf16, #tpu.memory_space<vmem>>, vector<1x8x256xbf16>
    %4 = vector.shape_cast %3 : vector<1x8x256xbf16> to vector<8x256xbf16>
    %c0_8 = arith.constant 0 : index
    %5 = memref.load %arg2[%c0_8] : memref<2xf32, #tpu.memory_space<smem>>
    %cst = arith.constant dense<0.000000e+00> : vector<8x8xf32>
    %6 = tpu.matmul %4, %4, %cst {dimension_numbers = #tpu.dot_dimension_numbers<[1], [1], [0], [0], [0, 0, 1, 0], [], []>} : vector<8x256xbf16>, vector<8x256xbf16>, vector<8x8xf32> -> vector<8x8xf32>
    %cst_9 = arith.constant dense<0xFF800000> : vector<8xf32>
    %7 = vector.multi_reduction <maximumf>, %6, %cst_9 [1] : vector<8x8xf32> to vector<8xf32>
    %8 = vector.shape_cast %7 : vector<8xf32> to vector<8x1xf32>
    %9 = vector.broadcast %8 : vector<8x1xf32> to vector<8x8xf32>
    %10 = arith.subf %9, %6 : vector<8x8xf32>
    %cst_10 = arith.constant dense<0xFF800000> : vector<8xf32>
    %11 = vector.multi_reduction <maximumf>, %10, %cst_10 [1] : vector<8x8xf32> to vector<8xf32>
    %12 = vector.shape_cast %11 : vector<8xf32> to vector<8x1xf32>
    %13 = vector.broadcast %12 : vector<8x1xf32> to vector<8x8xf32>
    %14 = arith.subf %10, %13 : vector<8x8xf32>
    %15 = math.exp %14 : vector<8x8xf32>
    %cst_11 = arith.constant dense<0.000000e+00> : vector<8xf32>
    %16 = vector.multi_reduction <add>, %15, %cst_11 [1] : vector<8x8xf32> to vector<8xf32>
    %17 = vector.shape_cast %16 : vector<8xf32> to vector<8x1xf32>
    %18 = tpu.reciprocal %17 {approx = true} : vector<8x1xf32> -> vector<8x1xf32>
    %19 = vector.broadcast %18 : vector<8x1xf32> to vector<8x8xf32>
    %20 = arith.mulf %15, %19 : vector<8x8xf32>
    %21 = arith.truncf %20 : vector<8x8xf32> to vector<8x8xbf16>
    %cst_12 = arith.constant dense<0.000000e+00> : vector<8x256xf32>
    %22 = tpu.matmul %21, %4, %cst_12 {dimension_numbers = #tpu.dot_dimension_numbers<[1], [0], [0], [1], [0, 0, 1, 1], [], []>} : vector<8x8xbf16>, vector<8x256xbf16>, vector<8x256xf32> -> vector<8x256xf32>
    %23 = vector.broadcast %5 : f32 to vector<8x256xf32>
    %24 = arith.mulf %23, %22 : vector<8x256xf32>
    %25 = arith.extf %4 : vector<8x256xbf16> to vector<8x256xf32>
    %26 = arith.addf %24, %25 : vector<8x256xf32>
    %27 = arith.truncf %26 : vector<8x256xf32> to vector<8x256xbf16>
    %cst_13 = arith.constant dense<0.000000e+00> : vector<8x256xf32>
    %28 = tpu.matmul %0, %27, %cst_13 {dimension_numbers = #tpu.dot_dimension_numbers<[1], [0], [0], [1], [0, 0, 1, 1], [], []>} : vector<8x8xbf16>, vector<8x256xbf16>, vector<8x256xf32> -> vector<8x256xf32>
    %29 = vector.broadcast %1 : vector<8x1xf32> to vector<8x256xf32>
    %30 = arith.mulf %28, %29 : vector<8x256xf32>
    %31 = vector.broadcast %2 : vector<8x1xf32> to vector<8x256xf32>
    %32 = arith.addf %30, %31 : vector<8x256xf32>
    %cst_14 = arith.constant 0.000000e+00 : f32
    %33 = vector.broadcast %cst_14 : f32 to vector<8x256xf32>
    %34 = arith.maximumf %32, %33 : vector<8x256xf32>
    %c0_15 = arith.constant 0 : index
    %c8 = arith.constant 8 : index
    %c0_16 = arith.constant 0 : index
    %35 = vector.load %arg1[%c0_15, %c8, %c0_16] : memref<1x16x256xbf16, #tpu.memory_space<vmem>>, vector<1x8x256xbf16>
    %36 = vector.shape_cast %35 : vector<1x8x256xbf16> to vector<8x256xbf16>
    %c1 = arith.constant 1 : index
    %37 = memref.load %arg2[%c1] : memref<2xf32, #tpu.memory_space<smem>>
    %cst_17 = arith.constant dense<0.000000e+00> : vector<8x8xf32>
    %38 = tpu.matmul %36, %36, %cst_17 {dimension_numbers = #tpu.dot_dimension_numbers<[1], [1], [0], [0], [0, 0, 1, 0], [], []>} : vector<8x256xbf16>, vector<8x256xbf16>, vector<8x8xf32> -> vector<8x8xf32>
    %cst_18 = arith.constant dense<0xFF800000> : vector<8xf32>
    %39 = vector.multi_reduction <maximumf>, %38, %cst_18 [1] : vector<8x8xf32> to vector<8xf32>
    %40 = vector.shape_cast %39 : vector<8xf32> to vector<8x1xf32>
    %41 = vector.broadcast %40 : vector<8x1xf32> to vector<8x8xf32>
    %42 = arith.subf %41, %38 : vector<8x8xf32>
    %cst_19 = arith.constant dense<0xFF800000> : vector<8xf32>
    %43 = vector.multi_reduction <maximumf>, %42, %cst_19 [1] : vector<8x8xf32> to vector<8xf32>
    %44 = vector.shape_cast %43 : vector<8xf32> to vector<8x1xf32>
    %45 = vector.broadcast %44 : vector<8x1xf32> to vector<8x8xf32>
    %46 = arith.subf %42, %45 : vector<8x8xf32>
    %47 = math.exp %46 : vector<8x8xf32>
    %cst_20 = arith.constant dense<0.000000e+00> : vector<8xf32>
    %48 = vector.multi_reduction <add>, %47, %cst_20 [1] : vector<8x8xf32> to vector<8xf32>
    %49 = vector.shape_cast %48 : vector<8xf32> to vector<8x1xf32>
    %50 = tpu.reciprocal %49 {approx = true} : vector<8x1xf32> -> vector<8x1xf32>
    %51 = vector.broadcast %50 : vector<8x1xf32> to vector<8x8xf32>
    %52 = arith.mulf %47, %51 : vector<8x8xf32>
    %53 = arith.truncf %52 : vector<8x8xf32> to vector<8x8xbf16>
    %cst_21 = arith.constant dense<0.000000e+00> : vector<8x256xf32>
    %54 = tpu.matmul %53, %36, %cst_21 {dimension_numbers = #tpu.dot_dimension_numbers<[1], [0], [0], [1], [0, 0, 1, 1], [], []>} : vector<8x8xbf16>, vector<8x256xbf16>, vector<8x256xf32> -> vector<8x256xf32>
    %55 = vector.broadcast %37 : f32 to vector<8x256xf32>
    %56 = arith.mulf %55, %54 : vector<8x256xf32>
    %57 = arith.extf %36 : vector<8x256xbf16> to vector<8x256xf32>
    %58 = arith.addf %56, %57 : vector<8x256xf32>
    %59 = arith.truncf %58 : vector<8x256xf32> to vector<8x256xbf16>
    %cst_22 = arith.constant dense<0.000000e+00> : vector<8x256xf32>
    %60 = tpu.matmul %0, %59, %cst_22 {dimension_numbers = #tpu.dot_dimension_numbers<[1], [0], [0], [1], [0, 0, 1, 1], [], []>} : vector<8x8xbf16>, vector<8x256xbf16>, vector<8x256xf32> -> vector<8x256xf32>
    %61 = vector.broadcast %1 : vector<8x1xf32> to vector<8x256xf32>
    %62 = arith.mulf %60, %61 : vector<8x256xf32>
    %63 = vector.broadcast %2 : vector<8x1xf32> to vector<8x256xf32>
    %64 = arith.addf %62, %63 : vector<8x256xf32>
    %cst_23 = arith.constant 0.000000e+00 : f32
    %65 = vector.broadcast %cst_23 : f32 to vector<8x256xf32>
    %66 = arith.maximumf %64, %65 : vector<8x256xf32>
    %67 = arith.addf %34, %66 : vector<8x256xf32>
    %cst_24 = arith.constant dense<0.000000e+00> : vector<8xf32>
    %68 = vector.multi_reduction <add>, %67, %cst_24 [1] : vector<8x256xf32> to vector<8xf32>
    %69 = vector.shape_cast %68 : vector<8xf32> to vector<8x1xf32>
    %cst_25 = arith.constant 2.560000e+02 : f32
    %70 = vector.broadcast %cst_25 : f32 to vector<8x1xf32>
    %71 = arith.divf %69, %70 : vector<8x1xf32>
    %c0_26 = arith.constant 0 : index
    %c0_27 = arith.constant 0 : index
    %72 = vector.load %arg6[%c0_26, %c0_27] : memref<8x8xf32, #tpu.memory_space<vmem>>, vector<8x8xf32>
    %cst_28 = arith.constant dense<0.000000e+00> : vector<8x1xf32>
    %73 = tpu.matmul %72, %71, %cst_28 {dimension_numbers = #tpu.dot_dimension_numbers<[1], [0], [0], [1], [0, 0, 1, 1], [], []>} : vector<8x8xf32>, vector<8x1xf32>, vector<8x1xf32> -> vector<8x1xf32>
    %c0_29 = arith.constant 0 : index
    %c0_30 = arith.constant 0 : index
    %74 = vector.load %arg7[%c0_29, %c0_30] : memref<8x1xf32, #tpu.memory_space<vmem>>, vector<8x1xf32>
    %75 = arith.addf %73, %74 : vector<8x1xf32>
    %76 = arith.negf %75 : vector<8x1xf32>
    %77 = math.exp %76 : vector<8x1xf32>
    %cst_31 = arith.constant 1.000000e+00 : f32
    %78 = vector.broadcast %cst_31 : f32 to vector<8x1xf32>
    %79 = arith.addf %78, %77 : vector<8x1xf32>
    %80 = arith.divf %78, %79 : vector<8x1xf32>
    %81 = vector.broadcast %80 : vector<8x1xf32> to vector<8x256xf32>
    %82 = arith.mulf %67, %81 : vector<8x256xf32>
    %83 = arith.addf %67, %82 : vector<8x256xf32>
    %cst_32 = arith.constant 0.000000e+00 : f32
    %84 = vector.broadcast %cst_32 : f32 to vector<8x256xf32>
    %85 = arith.maximumf %83, %84 : vector<8x256xf32>
    %c0_33 = arith.constant 0 : index
    %c0_34 = arith.constant 0 : index
    %86 = vector.load %arg8[%c0_33, %c0_34] : memref<8x8xbf16, #tpu.memory_space<vmem>>, vector<8x8xbf16>
    %87 = arith.truncf %85 : vector<8x256xf32> to vector<8x256xbf16>
    %cst_35 = arith.constant dense<0.000000e+00> : vector<8x256xf32>
    %88 = tpu.matmul %86, %87, %cst_35 {dimension_numbers = #tpu.dot_dimension_numbers<[1], [0], [0], [1], [0, 0, 1, 1], [], []>} : vector<8x8xbf16>, vector<8x256xbf16>, vector<8x256xf32> -> vector<8x256xf32>
    %c0_36 = arith.constant 0 : index
    %c0_37 = arith.constant 0 : index
    %89 = vector.load %arg9[%c0_36, %c0_37] : memref<8x1xf32, #tpu.memory_space<vmem>>, vector<8x1xf32>
    %90 = vector.broadcast %89 : vector<8x1xf32> to vector<8x256xf32>
    %91 = arith.addf %88, %90 : vector<8x256xf32>
    %92 = arith.truncf %91 : vector<8x256xf32> to vector<8x256xbf16>
    %c0_38 = arith.constant 0 : index
    %c0_39 = arith.constant 0 : index
    %c0_40 = arith.constant 0 : index
    %93 = vector.load %arg12[%c0_38, %c0_39, %c0_40] : memref<1x8x256xbf16, #tpu.memory_space<vmem>>, vector<1x8x256xbf16>
    %94 = vector.shape_cast %93 : vector<1x8x256xbf16> to vector<8x256xbf16>
    %95 = vector.shape_cast %92 : vector<8x256xbf16> to vector<1x8x256xbf16>
    tpu.vector_store %arg12[%c0_38, %c0_39, %c0_40], %95 {strides = array<i32>} : memref<1x8x256xbf16, #tpu.memory_space<vmem>>, vector<1x8x256xbf16>,
    %c0_41 = arith.constant 0 : index
    %c0_42 = arith.constant 0 : index
    %96 = vector.load %arg10[%c0_41, %c0_42] : memref<8x8xf32, #tpu.memory_space<vmem>>, vector<8x8xf32>
    %cst_43 = arith.constant dense<0.000000e+00> : vector<8x1xf32>
    %97 = tpu.matmul %96, %71, %cst_43 {dimension_numbers = #tpu.dot_dimension_numbers<[1], [0], [0], [1], [0, 0, 1, 1], [], []>} : vector<8x8xf32>, vector<8x1xf32>, vector<8x1xf32> -> vector<8x1xf32>
    %c0_44 = arith.constant 0 : index
    %c0_45 = arith.constant 0 : index
    %98 = vector.load %arg11[%c0_44, %c0_45] : memref<8x1xf32, #tpu.memory_space<vmem>>, vector<8x1xf32>
    %99 = arith.addf %97, %98 : vector<8x1xf32>
    %c0_46 = arith.constant 0 : index
    %c0_47 = arith.constant 0 : index
    %c0_48 = arith.constant 0 : index
    %100 = vector.load %arg13[%c0_46, %c0_47, %c0_48] : memref<1x8x1xf32, #tpu.memory_space<vmem>>, vector<1x8x1xf32>
    %101 = vector.shape_cast %100 : vector<1x8x1xf32> to vector<8x1xf32>
    %102 = vector.shape_cast %99 : vector<8x1xf32> to vector<1x8x1xf32>
    tpu.vector_store %arg13[%c0_46, %c0_47, %c0_48], %102 {strides = array<i32>} : memref<1x8x1xf32, #tpu.memory_space<vmem>>, vector<1x8x1xf32>,
    return
  }
  func.func @transform_0(%arg0: i32) -> (i32, i32, i32) {
    %c0_i32 = arith.constant 0 : i32
    %c0_i32_0 = arith.constant 0 : i32
    %c0_i32_1 = arith.constant 0 : i32
    return %arg0, %c0_i32, %c0_i32_0 : i32, i32, i32
  }
  func.func @transform_1(%arg0: i32) -> i32 {
    %c0_i32 = arith.constant 0 : i32
    %c0_i32_0 = arith.constant 0 : i32
    return %c0_i32 : i32
  }
  func.func @transform_2(%arg0: i32) -> (i32, i32) {
    %c0_i32 = arith.constant 0 : i32
    %c0_i32_0 = arith.constant 0 : i32
    %c0_i32_1 = arith.constant 0 : i32
    return %c0_i32, %c0_i32_0 : i32, i32
  }
  func.func @transform_3(%arg0: i32) -> (i32, i32) {
    %c0_i32 = arith.constant 0 : i32
    %c0_i32_0 = arith.constant 0 : i32
    %c0_i32_1 = arith.constant 0 : i32
    return %c0_i32, %c0_i32_0 : i32, i32
  }
  func.func @transform_4(%arg0: i32) -> (i32, i32) {
    %c0_i32 = arith.constant 0 : i32
    %c0_i32_0 = arith.constant 0 : i32
    %c0_i32_1 = arith.constant 0 : i32
    return %c0_i32, %c0_i32_0 : i32, i32
  }
  func.func @transform_5(%arg0: i32) -> (i32, i32) {
    %c0_i32 = arith.constant 0 : i32
    %c0_i32_0 = arith.constant 0 : i32
    %c0_i32_1 = arith.constant 0 : i32
    return %c0_i32, %c0_i32_0 : i32, i32
  }
  func.func @transform_6(%arg0: i32) -> (i32, i32) {
    %c0_i32 = arith.constant 0 : i32
    %c0_i32_0 = arith.constant 0 : i32
    %c0_i32_1 = arith.constant 0 : i32
    return %c0_i32, %c0_i32_0 : i32, i32
  }
  func.func @transform_7(%arg0: i32) -> (i32, i32) {
    %c0_i32 = arith.constant 0 : i32
    %c0_i32_0 = arith.constant 0 : i32
    %c0_i32_1 = arith.constant 0 : i32
    return %c0_i32, %c0_i32_0 : i32, i32
  }
  func.func @transform_8(%arg0: i32) -> (i32, i32) {
    %c0_i32 = arith.constant 0 : i32
    %c0_i32_0 = arith.constant 0 : i32
    %c0_i32_1 = arith.constant 0 : i32
    return %c0_i32, %c0_i32_0 : i32, i32
  }
  func.func @transform_9(%arg0: i32) -> (i32, i32) {
    %c0_i32 = arith.constant 0 : i32
    %c0_i32_0 = arith.constant 0 : i32
    %c0_i32_1 = arith.constant 0 : i32
    return %c0_i32, %c0_i32_0 : i32, i32
  }
  func.func @transform_10(%arg0: i32) -> (i32, i32) {
    %c0_i32 = arith.constant 0 : i32
    %c0_i32_0 = arith.constant 0 : i32
    %c0_i32_1 = arith.constant 0 : i32
    return %c0_i32, %c0_i32_0 : i32, i32
  }
  func.func @transform_11(%arg0: i32) -> (i32, i32, i32) {
    %c0_i32 = arith.constant 0 : i32
    %c0_i32_0 = arith.constant 0 : i32
    %c0_i32_1 = arith.constant 0 : i32
    return %arg0, %c0_i32, %c0_i32_0 : i32, i32, i32
  }
  func.func @transform_12(%arg0: i32) -> (i32, i32, i32) {
    %c0_i32 = arith.constant 0 : i32
    %c0_i32_0 = arith.constant 0 : i32
    %c0_i32_1 = arith.constant 0 : i32
    return %arg0, %c0_i32, %c0_i32_0 : i32, i32, i32
  }
}

</mosaic_0001>

<bundles_post_ra>
// kernel: cam2net_head_forward.2
= control target key start
LH: loop header
LB: loop body
LE: loop exit
PB: predicated region body
PF: predicated region fallthrough
CT: control target
= control target key end

     0   :  { %9 = vsyncpa [#allocation3], 0  ;;  %s1604_s0 = inlined_call_operand.hbm [shape: bf16[2,32,256], index: 0, kind: input, shape index: {}]   ;;  %s1605_s1 = inlined_call_operand.hbm [shape: bf16[16,288], index: 1, kind: input, shape index: {}]   ;;  %s1606_s2 = inlined_call_operand.hbm [shape: f32[16,1], index: 2, kind: input, shape index: {}]   ;;  %s1607_s3 = inlined_call_operand.hbm [shape: f32[16,1], index: 3, kind: input, shape index: {}]   ;;  %s1608_s4 = inlined_call_operand.hbm [shape: bf16[2,16,256], index: 4, kind: output, shape index: {}]  }
   0x1   :  { %11 = vsyncpa [#allocation3 + $0x1], 0 }
   0x2   :  { %12 = vsyncpa [#allocation6], 0 }
   0x3   :  { %13 = vsyncpa [#allocation9], 0 }
   0x4   :  { %14 = vsyncpa [#allocation4], 0 }
   0x5   :  { %16 = vsyncpa [#allocation4 + $0x1], 0  ;;  %s1267_s15 = smov 0   ;;  %s1269_s16 = smov 0  }
   0x6   :  { %s1271_s17 = smov 0   ;;  %s1273_s18 = smov 0  }
   0x7 LB: > { %s1288_s19 = sadd.s32 4294967295, %s1219_s18   ;;  %s878_s20 = sadd.s32 4294967294, %s1219_s18   ;;  %s1219_s18 = sphi %s1273_s18, %s1631_s18   ;;  %s1215_s17 = sphi %s1271_s17, %s1630_s17   ;;  %s1211_s16 = sphi %s1269_s16, %s1629_s16   ;;  %s1207_s15 = sphi %s1267_s15, %s1628_s15  }
   0x8   : > { %p42_p0 = scmp.ne.s32.totalorder %s1211_s16, %s1207_s15  ;;  %p1609_p1 = scmp.eq.s32.totalorder %s1288_s19, 0 }
   0x9   : > { %p135_p3 = scmp.eq.s32.totalorder %s878_s20, 1  ;;  %p879_p5 = scmp.ge.s32.totalorder %s1219_s18, 1 }
   0xa   : > { %p1297_p4 = por %p1609_p1, %p42_p0  ;;  %p142_p7 = scmp.lt.s32.totalorder %s1219_s18, 3 }
   0xb   : > { %p1302_p6 = por %p135_p3, %p42_p0  ;;  %s1221_s24 = smov [#allocation5]  }
   0xc   : > { %s1612_s21 = scalar_select %p1297_p4, 1, 0 }
   0xd   : > { %s1613_s22 = scalar_select %p1302_p6, 1, 0 }
   0xe   : > { %p1307_p8 = pnand %p879_p5, %p142_p7  ;;  %s154_s25 = sshll.u32 %s1221_s24, 4  ;;  %s1311_s25 = int_to_ptr.vmem [resolvable:$true] %s154_s25 }
   0xf   : > { %s1222_s27 = smov [#allocation7]   ;;  %s1031_s5 = scalar_lea.hbm %s1605_s1, 384 }
  0x10   : > { %s1614_s23 = scalar_select %p1307_p8, 1, 0 }
  0x11   : > { %p944_p9 = pneg %p1307_p8  ;;  %s167_s28 = sshll.u32 %s1222_s27, 4  ;;  %s1322_s28 = int_to_ptr.vmem [resolvable:$true] %s167_s28 }
  0x12   : > { %p1032_p12 = scmp.ne.s32.totalorder %s1605_s1, %s1031_s5  ;;  %p1038_p5 = scmp.lt.u32.totalorder %s1031_s5, %s1605_s1 }
  0x13   : > { %p1318_p11 = pnand %p944_p9, %p1609_p1 }
  0x15   : > { %p1332_p13 = pneg %p1318_p11 }
  0x17   : > { %p1034_p0 = pnand %p1332_p13, %p1032_p12 }
  0x19   : > { %p1035_p3 = pneg %p1034_p0 }
  0x1b   : > { %p1040_p7 = pnand %p1038_p5, %p1035_p3 }
  0x1d   : > { %1043 = shalt.err (!%p1040_p7)
}
  0x1e   : > { %s1044_s11 = scalar_lea.vmem %s1311_s25, 384  ;;  %p1052_p2 = scmp.lt.s32.totalorder %s1311_s25, %s1311_s25 }
  0x1f   : > { %p1045_p9 = scmp.ne.s32.totalorder %s1311_s25, %s1044_s11  ;;  %p1053_p6 = scmp.lt.s32.totalorder %s1044_s11, %s1044_s11 }
  0x21   : > { %p1047_p10 = pnand %p1045_p9, %p1332_p13  ;;  %p1054_p12 = por %p1053_p6, %p1052_p2 }
  0x23   : > { %p1048_p1 = pneg %p1047_p10 }
  0x25   : > { %p1055_p0 = pnand %p1054_p12, %p1048_p1 }
  0x27   : > { %1058 = shalt.err (!%p1055_p0)
}
  0x28   : > { %s1223_s12 = smov 192   ;;  %s1224_s13 = smov 12  }
  0x29   : > { %947 = dma.hbm_to_vmem [thread:$0]  (!%p1318_p11), %s1605_s1, 384, %s1311_s25, [#allocation6], %s1223_s12, %s1223_s12, %s1224_s13  }
  0x2a   : > { %s1059_s29 = scalar_lea.hbm %s1606_s2, 256 }
  0x2b   : > { %p1060_p2 = scmp.ne.s32.totalorder %s1606_s2, %s1059_s29  ;;  %p1066_p10 = scmp.lt.u32.totalorder %s1059_s29, %s1606_s2 }
  0x2d   : > { %p1062_p1 = pnand %p1060_p2, %p1332_p13 }
  0x2f   : > { %p1063_p6 = pneg %p1062_p1 }
  0x31   : > { %p1068_p3 = pnand %p1066_p10, %p1063_p6 }
  0x33   : > { %1071 = shalt.err (!%p1068_p3)
}
  0x34   : > { %s1072_s25 = scalar_lea.vmem %s1322_s28, 256  ;;  %p1080_p12 = scmp.lt.s32.totalorder %s1322_s28, %s1322_s28 }
  0x35   : > { %p1073_p5 = scmp.ne.s32.totalorder %s1322_s28, %s1072_s25  ;;  %p1081_p0 = scmp.lt.s32.totalorder %s1072_s25, %s1072_s25 }
  0x37   : > { %p1075_p7 = pnand %p1073_p5, %p1332_p13  ;;  %p1082_p2 = por %p1081_p0, %p1080_p12 }
  0x39   : > { %p1076_p9 = pneg %p1075_p7 }
  0x3b   : > { %p1083_p1 = pnand %p1082_p2, %p1076_p9 }
  0x3d   : > { %1086 = shalt.err (!%p1083_p1)
}
  0x3e   : > { %s1225_s9 = smov 128   ;;  %s1226_s10 = smov 8  }
  0x3f   : > { %950 = dma.hbm_to_vmem [thread:$0]  (!%p1318_p11), %s1606_s2, 256, %s1322_s28, [#allocation6], %s1225_s9, %s1225_s9, %s1226_s10  }
  0x40   : > { %s1227_s13 = smov [#allocation8]   ;;  %s1380_s20 = sadd.s32 1, %s1219_s18  }
  0x41   : > { %s180_s14 = sshll.u32 %s1227_s13, 4  ;;  %s1087_s29 = scalar_lea.hbm %s1607_s3, 256  ;;  %s181_s14 = int_to_ptr.vmem [resolvable:$true] %s180_s14 }
  0x42   : > { %p1088_p6 = scmp.ne.s32.totalorder %s1607_s3, %s1087_s29  ;;  %p1094_p5 = scmp.lt.u32.totalorder %s1087_s29, %s1607_s3 }
  0x44   : > { %p1090_p10 = pnand %p1088_p6, %p1332_p13 }
  0x46   : > { %p1091_p3 = pneg %p1090_p10 }
  0x48   : > { %p1096_p7 = pnand %p1094_p5, %p1091_p3 }
  0x4a   : > { %1099 = shalt.err (!%p1096_p7)
}
  0x4b   : > { %s1100_s28 = scalar_lea.vmem %s181_s14, 256  ;;  %p1108_p2 = scmp.lt.s32.totalorder %s181_s14, %s181_s14 }
  0x4c   : > { %p1101_p9 = scmp.ne.s32.totalorder %s181_s14, %s1100_s28  ;;  %p1109_p1 = scmp.lt.s32.totalorder %s1100_s28, %s1100_s28 }
  0x4e   : > { %p1103_p12 = pnand %p1101_p9, %p1332_p13  ;;  %p1110_p4 = por %p1109_p1, %p1108_p2 }
  0x50   : > { %p1104_p0 = pneg %p1103_p12 }
  0x52   : > { %p1111_p8 = pnand %p1110_p4, %p1104_p0 }
  0x54   : > { %1114 = shalt.err (!%p1111_p8)
}
  0x55   : > { %953 = dma.hbm_to_vmem [thread:$0]  (!%p1318_p11), %s1607_s3, 256, %s181_s14, [#allocation9], %s1225_s9, %s1225_s9, %s1226_s10  }
  0x56   : > { %s26_s8 = ssub.s32 %s1219_s18, %s1380_s20  ;;  %s29_s26 = sadd.s32 1, %s1215_s17 }
  0x57   : > { %p27_p4 = scmp.eq.s32.totalorder %s26_s8, 0  ;;  %p36_p8 = scmp.ne.s32.totalorder %s1215_s17, %s1211_s16 }
  0x58   : > { %p37_p13 = scmp.eq.s32.totalorder %s1219_s18, 0  ;;  %p965_p6 = scmp.lt.s32.totalorder %s1219_s18, 2 }
  0x59   : > { %s1411_s12 = scalar_select %p27_p4, %s1215_s17, %s29_s26  }
  0x5a   : > { %p38_p10 = por %p37_p13, %p36_p8  ;;  %p1617_p3 = scmp.eq.s32.totalorder %s1288_s19, 1 }
  0x5b   : > { %s194_s24 = sand.u32 1, %s1215_s17   ;;  %s920_s27 = sshll.u32 %s1219_s18, 9 }
  0x5c   : > { %p1415_p5 = por %p1617_p3, %p36_p8  ;;  %s884_s29 = sshll.u32 %s194_s24, 5 }
  0x5d   : > { %s1424_s14 = scalar_lea.hbm %s1604_s0, %s920_s27  ;;  %s198_s6 = scalar_lea.vmem [#allocation2], %s884_s29 }
  0x5e   : > { %s205_s7 = sshll.u32 %s198_s6, 4  ;;  %p1426_p11 = pnand %p965_p6, %p38_p10  ;;  %s1430_s7 = int_to_ptr.vmem [resolvable:$true] %s205_s7 }
  0x5f   : > { %s1432_s25 = scalar_lea.sflag [#allocation3], %s194_s24  ;;  %s1115_s11 = scalar_lea.hbm %s1424_s14, 512 }
  0x60   : > { %p1116_p7 = scmp.ne.s32.totalorder %s1424_s14, %s1115_s11  ;;  %p1117_p9 = pneg %p1426_p11 }
  0x61   : > { %s1120_s27 = scalar_lea.hbm %s1604_s0, 1024  ;;  %p1121_p2 = scmp.lt.u32.totalorder %s1424_s14, %s1604_s0 }
  0x62   : > { %p1118_p12 = pnand %p1117_p9, %p1116_p7  ;;  %p1122_p1 = scmp.lt.u32.totalorder %s1120_s27, %s1115_s11 }
  0x63   : > { %p1124_p8 = scmp.lt.u32.totalorder %s1115_s11, %s1424_s14 }
  0x64   : > { %p1119_p0 = pneg %p1118_p12  ;;  %p1123_p4 = por %p1122_p1, %p1121_p2 }
  0x66   : > { %p1125_p13 = por %p1124_p8, %p1123_p4 }
  0x68   : > { %p1126_p6 = pnand %p1125_p13, %p1119_p0 }
  0x6a   : > { %1129 = shalt.err (!%p1126_p6)
}
  0x6b   : > { %s1130_s24 = scalar_lea.vmem %s1430_s7, 512  ;;  %s1228_s5 = smov [#allocation2]  }
  0x6c   : > { %p1131_p10 = scmp.ne.s32.totalorder %s1430_s7, %s1130_s24  ;;  %s1135_s6 = sshll.u32 %s1228_s5, 4  ;;  %s1136_s6 = int_to_ptr.vmem [resolvable:$false] %s1135_s6 }
  0x6d   : > { %s1137_s8 = scalar_lea.vmem %s1136_s6, 1024  ;;  %p1138_p12 = scmp.lt.s32.totalorder %s1430_s7, %s1136_s6 }
  0x6e   : > { %p1133_p3 = pnand %p1131_p10, %p1117_p9  ;;  %p1139_p2 = scmp.lt.s32.totalorder %s1137_s8, %s1130_s24 }
  0x70   : > { %p1134_p7 = pneg %p1133_p3  ;;  %p1140_p1 = por %p1139_p2, %p1138_p12 }
  0x72   : > { %p1141_p4 = pnand %p1140_p1, %p1134_p7 }
  0x74   : > { %1144 = shalt.err (!%p1141_p4)
}
  0x75   : > { %957 = dma.hbm_to_vmem [thread:$0]  (!%p1426_p11), %s1424_s14, 512, %s1430_s7, %s1432_s25, %s1225_s9, %s1225_s9, %s1226_s10  }
  0x76   : > { %p1620_p9 = scmp.ne.s32.totalorder %s1614_s23, 0 }
  0x77   : > { %s1466_s11 = sand.u32 (!%p1620_p9), 1, %s1211_s16   ;;  %p1621_p0 = scmp.ne.s32.totalorder (!%p1620_p9), %s1612_s21, 0 }
  0x78   : > { %217 = sbr.rel (%p1620_p9) target bundleno = 709 (0x2c5), region = 36  ;;  %s888_s26 = sshll.u32 (!%p1620_p9), %s1466_s11, 5 }
  0x79   : > { %s220_s27 = scalar_lea.sflag (!%p1620_p9), [#allocation3], %s1466_s11  ;;  %s223_s29 = scalar_lea.vmem (!%p1620_p9), [#allocation2], %s888_s26 }
  0x7f   : > { %1190 = dma.done.wait (%p1621_p0), %s220_s27, 512  }
  0x80   : > { %1192 = vsyncadd (%p1621_p0), %s220_s27, 4294966784  ;;  %p1622_p8 = scmp.eq.s32.totalorder %s1288_s19, 0 }
  0x82   : > { %1194 = dma.done.wait (%p1622_p8), [#allocation6], 640   ;;  %p1623_p11 = pmov %p1622_p8 }
  0x83   : > { %p1624_p13 = pmov %p1622_p8 }
  0x84   : > { %1196 = vsyncadd (%p1623_p11), [#allocation6], 4294966656 }
  0x85   : > { %1198 = dma.done.wait (%p1624_p13), [#allocation9], 256   ;;  %p1625_p6 = pmov %p1622_p8 }
  0x86   : > { %v265_v0 = vlaneseq  ;;  %v263_v5 = vld [vmem:[%s223_s29 + $0x10] sm:$0xff]  ;;  %v264_v6 = vld [vmem:[%s223_s29 + $0x18] sm:$0xff]  ;;  %v261_v7 = vld [vmem:[%s223_s29] sm:$0xff]  ;;  %s1229_s21 = smov 17   ;;  %vm338_vm6 = vcmask 138240   ;;  %s1230_s23 = smov 127  }
  0x87   : > { %1200 = vsyncadd (%p1625_p6), [#allocation9], 4294967040  ;;  %v899_v8 = vcombine.low %v263_v5, %v264_v6  ;;  %v262_v9 = vld [vmem:[%s223_s29 + $0x8] sm:$0xff]  ;;  %v900_v11 = vcombine.high %v263_v5, %v264_v6  ;;  %s1231_s9 = smov 111   ;;  %s1232_s10 = smov 95   ;;  %v1238_v60 = vmov 0  }
  0x88   : > { %v266_v1 = vand.u32 127, %v265_v0  ;;  %v897_v10 = vcombine.low %v261_v7, %v262_v9  ;;  %v898_v12 = vcombine.high %v261_v7, %v262_v9  ;;  %vm908_vm7 = vmneg %vm338_vm6  ;;  %s1233_s14 = smov 126   ;;  %s1234_s7 = smov 112   ;;  %v1029_v59 = vld [vmem:[#allocation5 + $0x4] ss:$12 sps:$4 sm:$0xff]   ;;  %701 = vmatprep.mubr.bf16.mxu0 %v1238_v60  ;;  %1022 = vset.pattern.permute.xlu1 %v1238_v60  ;;  %v712_v61 = vld [vmem:[#allocation7] sm:$0xff] }
  0x89   : > { %375 = vrot.lane.b32.xlu1 %v899_v8, %s1229_s21  ;;  %s1235_s28 = smov 110   ;;  %s1236_s25 = smov 96   ;;  %658 = vmatprep.mubr.bf16.mxu1 %v1029_v59  ;;  %v713_v62 = vld [vmem:[#allocation7 + $0x8] sm:$0xff]  ;;  %v729_v63 = vld [vmem:[#allocation8 + $0x8] sm:$0xff]  ;;  %v728_v0 = vld [vmem:[#allocation8] sm:$0xff]  ;;  %vm439_vm8 = vcmask 1039360  }
  0x8a   : > { %v267_v2 = vadd.s32 128, %v266_v1  ;;  %v272_v3 = vand.u32 15, %v266_v1  ;;  %371 = vrot.lane.b32.xlu0 %v897_v10, %s1229_s21  ;;  %s1237_s30 = smov 94   ;;  %vm464_vm9 = vcmask 1031168   ;;  %vm489_vm10 = vcmask 916480   ;;  %s892_s24 = sshll.u32 %s1466_s11, 4 }
  0x8b   : > { %1021 = vset.pattern.permute.xlu0 %v1238_v60  ;;  %vm510_vm11 = vcmask 908288   ;;  %vm531_vm12 = vcmask 900096   ;;  %vm552_vm13 = vcmask 785408   ;;  %vm573_vm14 = vcmask 777216   ;;  %s259_s5 = scalar_lea.vmem [#allocation10], %s892_s24  ;;  %s923_s8 = sshll.u32 %s1288_s19, 8 }
  0x8c   : > { %v279_v4 = vand.u32 15, %v267_v2  ;;  %vm303_vm0 = vcmp.ne.s32.totalorder %v272_v3, 0  ;;  %vm292_vm3 = vcmp.ne.s32.totalorder %v272_v3, 15  ;;  %vm594_vm15 = vcmask 769024   ;;  %s776_s6 = sshll.u32 %s259_s5, 4  ;;  %s1560_s29 = scalar_lea.hbm %s1608_s4, %s923_s8  ;;  %s1555_s6 = int_to_ptr.vmem [resolvable:$true] %s776_s6 }
  0x8d   : > { %377 = vrot.lane.b32.xlu1 %v900_v11, %s1229_s21  ;;  %s1239_s19 = smov [#allocation10]  }
  0x8e   : > { %vm304_vm1 = vcmp.ne.s32.totalorder %v279_v4, 0  ;;  %vm293_vm4 = vcmp.ne.s32.totalorder %v279_v4, 15  ;;  %373 = vrot.lane.b32.xlu0 %v898_v12, %s1229_s21 }
  0x8f   : > { %vm309_vm2 = vmpackc.low %vm304_vm1, %vm303_vm0  ;;  %vm622_vm0 = vcmask 261120  }
  0x90   : > { %v310_v13 = vsel %vm309_vm2, %v261_v7, 0  ;;  %v311_v14 = vsel %vm309_vm2, %v262_v9, 0  ;;  %v312_v17 = vsel %vm309_vm2, %v263_v5, 0  ;;  %v313_v18 = vsel %vm309_vm2, %v264_v6, 0  ;;  %vm298_vm5 = vmpackc.low %vm293_vm4, %vm292_vm3 }
  0x91   : > { %v902_v15 = vcombine.high %v310_v13, %v311_v14  ;;  %v901_v16 = vcombine.low %v310_v13, %v311_v14  ;;  %v904_v19 = vcombine.high %v312_v17, %v313_v18  ;;  %v903_v20 = vcombine.low %v312_v17, %v313_v18 }
  0x92   : > { %v299_v21 = vsel %vm298_vm5, %v261_v7, 0  ;;  %v300_v22 = vsel %vm298_vm5, %v262_v9, 0  ;;  %v301_v25 = vsel %vm298_vm5, %v263_v5, 0  ;;  %v302_v26 = vsel %vm298_vm5, %v264_v6, 0 }
  0x93   : > { %407 = vrot.lane.b32.xlu1 %v902_v15, %s1229_s21  ;;  %405 = vrot.lane.b32.xlu0 %v901_v16, %s1229_s21  ;;  %v894_v23 = vcombine.high %v299_v21, %v300_v22  ;;  %v893_v24 = vcombine.low %v299_v21, %v300_v22  ;;  %v896_v27 = vcombine.high %v301_v25, %v302_v26 }
  0x94   : > { %v895_v28 = vcombine.low %v301_v25, %v302_v26 }
  0x97   : > { %411 = vrot.lane.b32.xlu1 %v904_v19, %s1229_s21  ;;  %409 = vrot.lane.b32.xlu0 %v903_v20, %s1229_s21 }
  0x9b   : > { %332 = vrot.lane.b32.xlu1 %v894_v23, %s1229_s21  ;;  %330 = vrot.lane.b32.xlu0 %v893_v24, %s1229_s21 }
  0x9f   : > { %336 = vrot.lane.b32.xlu1 %v896_v27, %s1229_s21  ;;  %334 = vrot.lane.b32.xlu0 %v895_v28, %s1229_s21  ;;  %s763_s21 = scalar_lea.sflag [#allocation4], %s1466_s11 }
  0xfb   : > { %v376_v29 = vpop.permute.xlu1 %375 }
  0xfc   : > { %v372_v30 = vpop.permute.xlu0 %371  ;;  %v1499_v41 = vsel %vm338_vm6, 0, %v376_v29 }
  0xfd   : > { %v382_v38 = vsel %vm338_vm6, 0, %v372_v30 }
  0xff   : > { %v378_v31 = vpop.permute.xlu1 %377 }
 0x100   : > { %v374_v32 = vpop.permute.xlu0 %373  ;;  %v380_v37 = vsel %vm338_vm6, %v376_v29, %v378_v31  ;;  %v388_v42 = vsel %vm338_vm6, %v378_v31, 0 }
 0x101   : > { %v386_v33 = vsel %vm338_vm6, %v374_v32, 0  ;;  %v379_v34 = vsel %vm338_vm6, %v372_v30, %v374_v32 }
 0x102   : > { %431 = vrot.lane.b32.xlu1 %v386_v33, %s1230_s23  ;;  %429 = vrot.lane.b32.xlu0 %v379_v34, %s1230_s23 }
 0x105   : > { %v408_v35 = vpop.permute.xlu1 %407  ;;  %v406_v36 = vpop.permute.xlu0 %405 }
 0x106   : > { %435 = vrot.lane.b32.xlu1 %v380_v37, %s1230_s23  ;;  %427 = vrot.lane.b32.xlu0 %v382_v38, %s1230_s23  ;;  %v420_v49 = vsel %vm338_vm6, %v408_v35, 0  ;;  %v413_v51 = vsel %vm338_vm6, %v406_v36, %v408_v35  ;;  %v416_v53 = vsel %vm338_vm6, 0, %v406_v36 }
 0x109   : > { %v412_v39 = vpop.permute.xlu1 %411  ;;  %v410_v40 = vpop.permute.xlu0 %409 }
 0x10a   : > { %433 = vrot.lane.b32.xlu1 %v1499_v41, %s1230_s23  ;;  %437 = vrot.lane.b32.xlu0 %v388_v42, %s1230_s23  ;;  %v414_v50 = vsel %vm338_vm6, %v410_v40, %v412_v39  ;;  %v418_v52 = vsel %vm338_vm6, 0, %v410_v40  ;;  %v422_v55 = vsel %vm338_vm6, %v412_v39, 0  ;;  %s1145_s23 = scalar_lea.vmem %s1555_s6, 256 }
 0x10b   : > { %p1146_p10 = scmp.ne.s32.totalorder %s1555_s6, %s1145_s23 }
 0x10d   : > { %v333_v43 = vpop.permute.xlu1 %332  ;;  %v331_v44 = vpop.permute.xlu0 %330  ;;  %p1147_p3 = pnand %p1146_p10, %p1415_p5 }
 0x10e   : > { %v339_v45 = vsel %vm338_vm6, %v331_v44, %v333_v43  ;;  %502 = vrot.lane.b32.xlu1 %v386_v33, %s1231_s9  ;;  %500 = vrot.lane.b32.xlu0 %v379_v34, %s1231_s9  ;;  %v352_v54 = vsel %vm338_vm6, %v333_v43, 0  ;;  %v346_v56 = vsel %vm338_vm6, 0, %v331_v44 }
 0x10f   : > { %626 = vmatprep.subr.bf16.mxu1 %v339_v45  ;;  %p1148_p7 = pneg %p1147_p3 }
 0x110   : > { %909 = vmatpush1.bf16.msk.msra.mxu1 %vm908_vm7, %v331_v44 }
 0x111   : > { %v337_v46 = vpop.permute.xlu1 %336  ;;  %v335_v47 = vpop.permute.xlu0 %334 }
 0x112   : > { %v340_v48 = vsel %vm338_vm6, %v335_v47, %v337_v46  ;;  %506 = vrot.lane.b32.xlu1 %v380_v37, %s1231_s9  ;;  %498 = vrot.lane.b32.xlu0 %v382_v38, %s1231_s9  ;;  %v349_v57 = vsel %vm338_vm6, 0, %v335_v47  ;;  %v354_v58 = vsel %vm338_vm6, %v337_v46, 0 }
 0x113   : > { %628 = vmatprep.subr.bf16.mxu1 %v340_v48 }
 0x114   : > { %911 = vmatpush1.bf16.msk.msra.mxu1 %vm908_vm7, %v335_v47 }
 0x116   : > { %504 = vrot.lane.b32.xlu1 %v1499_v41, %s1231_s9  ;;  %508 = vrot.lane.b32.xlu0 %v388_v42, %s1231_s9  ;;  %s1149_s9 = sshll.u32 %s1239_s19, 4  ;;  %s1150_s9 = int_to_ptr.vmem [resolvable:$false] %s1149_s9 }
 0x117   : > { %p1152_p12 = scmp.lt.s32.totalorder %s1555_s6, %s1150_s9 }
 0x11a   : > { %565 = vrot.lane.b32.xlu1 %v386_v33, %s1232_s10  ;;  %563 = vrot.lane.b32.xlu0 %v379_v34, %s1232_s10 }
 0x11e   : > { %571 = vrot.lane.b32.xlu1 %v388_v42, %s1232_s10  ;;  %561 = vrot.lane.b32.xlu0 %v382_v38, %s1232_s10 }
 0x122   : > { %456 = vrot.lane.b32.xlu1 %v420_v49, %s1233_s14  ;;  %569 = vrot.lane.b32.xlu0 %v380_v37, %s1232_s10 }
 0x126   : > { %460 = vrot.lane.b32.xlu1 %v414_v50, %s1233_s14  ;;  %454 = vrot.lane.b32.xlu0 %v413_v51, %s1233_s14 }
 0x12a   : > { %458 = vrot.lane.b32.xlu1 %v418_v52, %s1233_s14  ;;  %452 = vrot.lane.b32.xlu0 %v416_v53, %s1233_s14 }
 0x12e   : > { %481 = vrot.lane.b32.xlu1 %v352_v54, %s1234_s7  ;;  %462 = vrot.lane.b32.xlu0 %v422_v55, %s1233_s14 }
 0x132   : > { %479 = vrot.lane.b32.xlu0 %v339_v45, %s1234_s7  ;;  %485 = vrot.lane.b32.xlu1 %v340_v48, %s1234_s7 }
 0x136   : > { %477 = vrot.lane.b32.xlu0 %v346_v56, %s1234_s7  ;;  %483 = vrot.lane.b32.xlu1 %v349_v57, %s1234_s7 }
 0x13a   : > { %487 = vrot.lane.b32.xlu0 %v354_v58, %s1234_s7  ;;  %523 = vrot.lane.b32.xlu1 %v420_v49, %s1235_s28 }
 0x13e   : > { %521 = vrot.lane.b32.xlu0 %v413_v51, %s1235_s28  ;;  %527 = vrot.lane.b32.xlu1 %v414_v50, %s1235_s28 }
 0x142   : > { %519 = vrot.lane.b32.xlu0 %v416_v53, %s1235_s28  ;;  %525 = vrot.lane.b32.xlu1 %v418_v52, %s1235_s28 }
 0x146   : > { %529 = vrot.lane.b32.xlu0 %v422_v55, %s1235_s28  ;;  %544 = vrot.lane.b32.xlu1 %v352_v54, %s1236_s25 }
 0x14a   : > { %542 = vrot.lane.b32.xlu0 %v339_v45, %s1236_s25  ;;  %548 = vrot.lane.b32.xlu1 %v340_v48, %s1236_s25 }
 0x14e   : > { %540 = vrot.lane.b32.xlu0 %v346_v56, %s1236_s25  ;;  %546 = vrot.lane.b32.xlu1 %v349_v57, %s1236_s25 }
 0x152   : > { %550 = vrot.lane.b32.xlu0 %v354_v58, %s1236_s25  ;;  %586 = vrot.lane.b32.xlu1 %v420_v49, %s1237_s30 }
 0x156   : > { %584 = vrot.lane.b32.xlu0 %v413_v51, %s1237_s30  ;;  %582 = vrot.lane.b32.xlu1 %v416_v53, %s1237_s30 }
 0x15a   : > { %590 = vrot.lane.b32.xlu0 %v414_v50, %s1237_s30  ;;  %592 = vrot.lane.b32.xlu1 %v422_v55, %s1237_s30 }
 0x15e   : > { %567 = vrot.lane.b32.xlu0 %v1499_v41, %s1232_s10  ;;  %588 = vrot.lane.b32.xlu1 %v418_v52, %s1237_s30  ;;  %s1151_s10 = scalar_lea.vmem %s1150_s9, 512 }
 0x15f   : > { %p1153_p2 = scmp.lt.s32.totalorder %s1151_s10, %s1145_s23 }
 0x161   : > { %p1154_p1 = por %p1153_p2, %p1152_p12 }
 0x162   : > { %716 = vperm.xlu0 %1021, %v712_v61   ;;  %721 = vperm.xlu1 %1022, %v713_v62  }
 0x163   : > { %p1155_p4 = pnand %p1154_p1, %p1148_p7 }
 0x166   : > { %737 = vperm.xlu0 %1021, %v729_v63   ;;  %732 = vperm.xlu1 %1022, %v728_v0  }
 0x174   : > { %v432_v1 = vpop.permute.xlu1 %431  ;;  %v430_v2 = vpop.permute.xlu0 %429 }
 0x175   : > { %v441_v3 = vsel %vm439_vm8, %v430_v2, %v432_v1 }
 0x176   : > { %630 = vmatprep.subr.bf16.mxu1 %v441_v3 }
 0x178   : > { %v436_v4 = vpop.permute.xlu1 %435  ;;  %v428_v5 = vpop.permute.xlu0 %427 }
 0x179   : > { %v440_v6 = vsel %vm439_vm8, %v428_v5, %v430_v2 }
 0x17a   : > { %631 = vmatpush1.bf16.msra.mxu1 %v440_v6 }
 0x17c   : > { %v434_v7 = vpop.permute.xlu1 %433  ;;  %v438_v8 = vpop.permute.xlu0 %437 }
 0x17d   : > { %v443_v9 = vsel %vm439_vm8, %v436_v4, %v438_v8  ;;  %v442_v10 = vsel %vm439_vm8, %v434_v7, %v436_v4 }
 0x17e   : > { %632 = vmatprep.subr.bf16.mxu1 %v443_v9 }
 0x17f   : > { %633 = vmatpush1.bf16.msra.mxu1 %v442_v10 }
 0x180   : > { %v503_v11 = vpop.permute.xlu1 %502  ;;  %v501_v12 = vpop.permute.xlu0 %500 }
 0x181   : > { %v512_v43 = vsel %vm510_vm11, %v501_v12, %v503_v11 }
 0x184   : > { %v507_v13 = vpop.permute.xlu1 %506  ;;  %v499_v14 = vpop.permute.xlu0 %498 }
 0x185   : > { %v511_v46 = vsel %vm510_vm11, %v499_v14, %v501_v12 }
 0x188   : > { %v505_v15 = vpop.permute.xlu1 %504  ;;  %v509_v16 = vpop.permute.xlu0 %508 }
 0x189   : > { %v514_v47 = vsel %vm510_vm11, %v507_v13, %v509_v16  ;;  %v513_v50 = vsel %vm510_vm11, %v505_v15, %v507_v13 }
 0x18c   : > { %v1524_v17 = vpop.permute.xlu1 %565  ;;  %v1526_v18 = vpop.permute.xlu0 %563 }
 0x18d   : > { %v575_v3 = vsel %vm573_vm14, %v1526_v18, %v1524_v17  ;;  %v1027_v17 = vld [vmem:[#allocation5] ss:$12 sps:$4 sm:$0xff]  }
 0x190   : > { %v1528_v19 = vpop.permute.xlu1 %571  ;;  %v1530_v20 = vpop.permute.xlu0 %561 }
 0x191   : > { %v574_v8 = vsel %vm573_vm14, %v1530_v20, %v1526_v18  ;;  %v1030_v18 = vld [vmem:[#allocation5 + $0x8] ss:$12 sps:$4 sm:$0xff]  }
 0x194   : > { %v457_v21 = vpop.permute.xlu1 %456  ;;  %v1532_v22 = vpop.permute.xlu0 %569 }
 0x195   : > { %v577_v9 = vsel %vm573_vm14, %v1532_v22, %v1528_v19 }
 0x198   : > { %v461_v23 = vpop.permute.xlu1 %460  ;;  %v455_v24 = vpop.permute.xlu0 %454 }
 0x199   : > { %v466_v25 = vsel %vm464_vm9, %v455_v24, %v457_v21 }
 0x19a   : > { %634 = vmatprep.subr.bf16.mxu1 %v466_v25 }
 0x19c   : > { %v459_v26 = vpop.permute.xlu1 %458  ;;  %v453_v27 = vpop.permute.xlu0 %452 }
 0x19d   : > { %v465_v28 = vsel %vm464_vm9, %v453_v27, %v455_v24  ;;  %v467_v32 = vsel %vm464_vm9, %v459_v26, %v461_v23 }
 0x19e   : > { %635 = vmatpush1.bf16.msra.mxu1 %v465_v28 }
 0x1a0   : > { %v482_v29 = vpop.permute.xlu1 %481  ;;  %v463_v30 = vpop.permute.xlu0 %462 }
 0x1a1   : > { %v468_v31 = vsel %vm464_vm9, %v461_v23, %v463_v30 }
 0x1a2   : > { %636 = vmatprep.subr.bf16.mxu1 %v468_v31 }
 0x1a3   : > { %637 = vmatpush1.bf16.msra.mxu1 %v467_v32 }
 0x1a4   : > { %v486_v33 = vpop.permute.xlu1 %485  ;;  %v480_v34 = vpop.permute.xlu0 %479 }
 0x1a5   : > { %v491_v35 = vsel %vm489_vm10, %v480_v34, %v482_v29 }
 0x1a6   : > { %638 = vmatprep.subr.bf16.mxu1 %v491_v35 }
 0x1a8   : > { %v484_v36 = vpop.permute.xlu1 %483  ;;  %v478_v37 = vpop.permute.xlu0 %477 }
 0x1a9   : > { %v490_v38 = vsel %vm489_vm10, %v478_v37, %v480_v34  ;;  %v492_v42 = vsel %vm489_vm10, %v484_v36, %v486_v33 }
 0x1aa   : > { %639 = vmatpush1.bf16.msra.mxu1 %v490_v38 }
 0x1ac   : > { %v524_v39 = vpop.permute.xlu1 %523  ;;  %v488_v40 = vpop.permute.xlu0 %487 }
 0x1ad   : > { %v493_v41 = vsel %vm489_vm10, %v486_v33, %v488_v40 }
 0x1ae   : > { %640 = vmatprep.subr.bf16.mxu1 %v493_v41 }
 0x1af   : > { %641 = vmatpush1.bf16.msra.mxu1 %v492_v42 }
 0x1b0   : > { %v528_v44 = vpop.permute.xlu1 %527  ;;  %642 = vmatprep.subr.bf16.mxu1 %v512_v43  ;;  %v522_v45 = vpop.permute.xlu0 %521 }
 0x1b1   : > { %v533_v51 = vsel %vm531_vm12, %v522_v45, %v524_v39 }
 0x1b3   : > { %643 = vmatpush1.bf16.msra.mxu1 %v511_v46 }
 0x1b4   : > { %v526_v48 = vpop.permute.xlu1 %525  ;;  %644 = vmatprep.subr.bf16.mxu1 %v514_v47  ;;  %v520_v49 = vpop.permute.xlu0 %519 }
 0x1b5   : > { %v532_v54 = vsel %vm531_vm12, %v520_v49, %v522_v45  ;;  %v534_v58 = vsel %vm531_vm12, %v526_v48, %v528_v44 }
 0x1b7   : > { %645 = vmatpush1.bf16.msra.mxu1 %v513_v50 }
 0x1b8   : > { %v545_v52 = vpop.permute.xlu1 %544  ;;  %646 = vmatprep.subr.bf16.mxu1 %v533_v51  ;;  %v530_v53 = vpop.permute.xlu0 %529 }
 0x1b9   : > { %v535_v55 = vsel %vm531_vm12, %v528_v44, %v530_v53 }
 0x1bb   : > { %647 = vmatpush1.bf16.msra.mxu1 %v532_v54 }
 0x1bc   : > { %v549_v56 = vpop.permute.xlu1 %548  ;;  %648 = vmatprep.subr.bf16.mxu1 %v535_v55  ;;  %v543_v57 = vpop.permute.xlu0 %542 }
 0x1bd   : > { %v554_v59 = vsel %vm552_vm13, %v543_v57, %v545_v52 }
 0x1bf   : > { %649 = vmatpush1.bf16.msra.mxu1 %v534_v58 }
 0x1c0   : > { %v547_v60 = vpop.permute.xlu1 %546  ;;  %650 = vmatprep.subr.bf16.mxu1 %v554_v59  ;;  %v541_v61 = vpop.permute.xlu0 %540 }
 0x1c1   : > { %v553_v62 = vsel %vm552_vm13, %v541_v61, %v543_v57  ;;  %v555_v2 = vsel %vm552_vm13, %v547_v60, %v549_v56 }
 0x1c3   : > { %651 = vmatpush1.bf16.msra.mxu1 %v553_v62 }
 0x1c4   : > { %v587_v63 = vpop.permute.xlu1 %586  ;;  %v551_v0 = vpop.permute.xlu0 %550 }
 0x1c5   : > { %v556_v1 = vsel %vm552_vm13, %v549_v56, %v551_v0 }
 0x1c6   : > { %652 = vmatprep.subr.bf16.mxu1 %v556_v1 }
 0x1c7   : > { %653 = vmatpush1.bf16.msra.mxu1 %v555_v2 }
 0x1c8   : > { %v583_v4 = vpop.permute.xlu1 %582  ;;  %654 = vmatprep.subr.bf16.mxu1 %v575_v3  ;;  %v585_v5 = vpop.permute.xlu0 %584 }
 0x1c9   : > { %v596_v6 = vsel %vm594_vm15, %v585_v5, %v587_v63  ;;  %v595_v7 = vsel %vm594_vm15, %v583_v4, %v585_v5 }
 0x1ca   : > { %669 = vmatprep.subr.bf16.mxu0 %v596_v6 }
 0x1cb   : > { %655 = vmatpush1.bf16.msra.mxu1 %v574_v8  ;;  %670 = vmatpush1.bf16.msra.mxu0 %v595_v7 }
 0x1cc   : > { %v593_v10 = vpop.permute.xlu1 %592  ;;  %656 = vmatprep.subr.bf16.mxu1 %v577_v9  ;;  %v591_v11 = vpop.permute.xlu0 %590 }
 0x1cd   : > { %v598_v12 = vsel %vm594_vm15, %v591_v11, %v593_v10 }
 0x1ce   : > { %671 = vmatprep.subr.bf16.mxu0 %v598_v12 }
 0x1d0   : > { %v589_v13 = vpop.permute.xlu1 %588  ;;  %v568_v14 = vpop.permute.xlu0 %567 }
 0x1d1   : > { %v576_v15 = vsel %vm573_vm14, %v568_v14, %v1532_v22  ;;  %v597_v16 = vsel %vm594_vm15, %v589_v13, %v591_v11 }
 0x1d2   : > { %657 = vmatpush1.bf16.msra.mxu1 %v576_v15  ;;  %672 = vmatpush1.bf16.msra.mxu0 %v597_v16 }
 0x1d5   : > { %659 = vmatmul.mubr.bf16.vlgmr.msra.gmra.mrb[0].mxu1 %v1027_v17  ;;  %912 = vmatmul.mubr.msk.bf16.vlgmr.msra.gmra.mrb[0].mxu0 %vm622_vm0, %v1030_v18 }
 0x1e1   : > { %v722_v19 = vpop.permute.xlu1 %721  ;;  %v717_v20 = vpop.permute.xlu0 %716 }
 0x1e5   : > { %v733_v21 = vpop.permute.xlu1 %732  ;;  %v738_v40 = vpop.permute.xlu0 %737 }
 0x2a8   : > { %v660_v23 = vpop.f32.mrb[0].mxu1  ;;  %v703_v24 = vpop.f32.mrb[0].mxu0 }
 0x2a9   : > { %v704_v25 = vadd.f32 %v703_v24, %v660_v23  ;;  %v662_v26 = vpop.f32.mrb[1].mxu1  ;;  %v705_v27 = vpop.f32.mrb[1].mxu0 }
 0x2aa   : > { %v706_v22 = vadd.f32 %v705_v27, %v662_v26  ;;  %v664_v28 = vpop.f32.mrb[2].mxu1  ;;  %v707_v29 = vpop.f32.mrb[2].mxu0 }
 0x2ab   : > { %v708_v30 = vadd.f32 %v707_v29, %v664_v28  ;;  %v724_v31 = vmul.f32 %v717_v20, %v704_v25  ;;  %v666_v32 = vpop.f32.mrb[3].mxu1  ;;  %v709_v33 = vpop.f32.mrb[3].mxu0 }
 0x2ac   : > { %v725_v34 = vmul.f32 %v717_v20, %v706_v22  ;;  %v710_v35 = vadd.f32 %v709_v33, %v666_v32 }
 0x2ad   : > { %v740_v36 = vadd.f32 %v733_v21, %v724_v31  ;;  %v726_v37 = vmul.f32 %v722_v19, %v708_v30 }
 0x2ae   : > { %v741_v38 = vadd.f32 %v733_v21, %v725_v34  ;;  %v727_v39 = vmul.f32 %v722_v19, %v710_v35 }
 0x2af   : > { %v744_v41 = vmax.f32 %v740_v36, 0.0  ;;  %v742_v42 = vadd.f32 %v738_v40, %v726_v37 }
 0x2b0   : > { %v745_v43 = vmax.f32 %v741_v38, 0.0  ;;  %v743_v44 = vadd.f32 %v738_v40, %v727_v39 }
 0x2b1   : > { %v746_v45 = vmax.f32 %v742_v42, 0.0 }
 0x2b2   : > { %v921_v46 = vpack.c.bf16 %v745_v43, %v744_v41  ;;  %v747_v47 = vmax.f32 %v743_v44, 0.0 }
 0x2b4   : > { %760 = vst [vmem:[%s259_s5] sm:$0xff] %v921_v46  ;;  %v922_v48 = vpack.c.bf16 %v747_v47, %v746_v45 }
 0x2b6   : > { %761 = vst [vmem:[%s259_s5 + $0x8] sm:$0xff] %v922_v48 }
 0x2b7   : > { %1158 = shalt.err (!%p1155_p4)
}
 0x2b8   : > { %s1159_s14 = scalar_lea.hbm %s1560_s29, 256  ;;  %s1163_s25 = scalar_lea.hbm %s1608_s4, 512 }
 0x2b9   : > { %p1160_p9 = scmp.ne.s32.totalorder %s1560_s29, %s1159_s14  ;;  %p1164_p11 = scmp.lt.u32.totalorder %s1560_s29, %s1608_s4 }
 0x2ba   : > { %p1165_p13 = scmp.lt.u32.totalorder %s1163_s25, %s1159_s14  ;;  %p1167_p10 = scmp.lt.u32.totalorder %s1159_s14, %s1560_s29 }
 0x2bb   : > { %p1161_p0 = pnand %p1160_p9, %p1415_p5 }
 0x2bc   : > { %p1166_p6 = por %p1165_p13, %p1164_p11 }
 0x2bd   : > { %p1162_p8 = pneg %p1161_p0 }
 0x2be   : > { %p1168_p3 = por %p1167_p10, %p1166_p6 }
 0x2c0   : > { %p1169_p7 = pnand %p1168_p3, %p1162_p8 }
 0x2c2   : > { %1172 = shalt.err (!%p1169_p7)
}
 0x2c3   : > { %s1240_s5 = smov 128   ;;  %s1241_s8 = smov 8  }
 0x2c4   : > { %942 = dma.vmem_to_hbm [thread:$0]  (%p1415_p5), %s1555_s6, 256, %s1560_s29, %s763_s21, %s1240_s5, %s1240_s5, %s1241_s8  }
 0x2c5 PF: > { %s791_s26 = sand.u32 1, %s1207_s15   ;;  %p1626_p12 = scmp.ne.s32.totalorder %s1613_s22, 0 }
 0x2c6   : > { %p1627_p2 = scmp.ge.s32.totalorder %s1219_s18, 2  ;;  %s792_s27 = scalar_lea.sflag [#allocation4], %s791_s26 }
 0x2c8   : > { %p959_p1 = pnand %p1627_p2, %p1626_p12 }
 0x2ca   : > { %1202 = dma.done.wait (!%p959_p1), %s792_s27, 256  }
 0x2cb   : > { %1204 = vsyncadd (!%p959_p1), %s792_s27, 4294967040  ;;  %p19_p4 = scmp.ge.s32.totalorder %s1380_s20, 4   ;;  %s1628_s15 = smov %s1211_s16 }
 0x2cc   : > { %s1629_s16 = smov %s1215_s17  ;;  %s1630_s17 = smov %s1411_s12 }
 0x2cd   : > { %s1631_s18 = smov %s1380_s20  ;;  %21 = sbr.rel (!%p19_p4) target bundleno = 7 (0x7), region = 93 }
 0x2d4   :  { %797 = vsyncpa [#allocation3], 1 }
 0x2d5   :  { %799 = vsyncpa [#allocation3 + $0x1], 1 }
 0x2d6   :  { %800 = vsyncpa [#allocation6], 1 }
 0x2d7   :  { %801 = vsyncpa [#allocation9], 1 }
 0x2d8   :  { %802 = vsyncpa [#allocation4], 1 }
 0x2d9   :  { %804 = vsyncpa [#allocation4 + $0x1], 1 }

// kernel: cam2net_head_forward.3
= control target key start
LH: loop header
LB: loop body
LE: loop exit
PB: predicated region body
PF: predicated region fallthrough
CT: control target
= control target key end

     0   :  { %s2664_s0 = inlined_call_operand.hbm [shape: bf16[2,16,256], index: 0, kind: input, shape index: {}]   ;;  %s2665_s1 = inlined_call_operand.hbm [shape: f32[2], index: 1, kind: input, shape index: {}]   ;;  %s2666_s2 = inlined_call_operand.hbm [shape: bf16[8,8], index: 2, kind: input, shape index: {}]   ;;  %s2667_s3 = inlined_call_operand.hbm [shape: f32[8,1], index: 3, kind: input, shape index: {}]   ;;  %s2668_s4 = inlined_call_operand.hbm [shape: f32[8,1], index: 4, kind: input, shape index: {}]   ;;  %s2669_s5 = inlined_call_operand.hbm [shape: f32[8,8], index: 5, kind: input, shape index: {}]   ;;  %s2670_s6 = inlined_call_operand.hbm [shape: f32[8,1], index: 6, kind: input, shape index: {}]   ;;  %s2671_s7 = inlined_call_operand.hbm [shape: bf16[8,8], index: 7, kind: input, shape index: {}]   ;;  %s2672_s8 = inlined_call_operand.hbm [shape: f32[8,1], index: 8, kind: input, shape index: {}]   ;;  %s2673_s9 = inlined_call_operand.hbm [shape: f32[8,8], index: 9, kind: input, shape index: {}]   ;;  %s2674_s10 = inlined_call_operand.hbm [shape: f32[8,1], index: 10, kind: input, shape index: {}]   ;;  %s2675_s11 = inlined_call_operand.hbm [shape: bf16[2,8,256], index: 11, kind: output, shape index: {0}]   ;;  %s2676_s12 = inlined_call_operand.hbm [shape: f32[2,8,1], index: 12, kind: output, shape index: {1}]  }
   0x1   :  { %2684 = sst [smem:[#allocation34_spill]] %s2664_s0 }
   0x2   :  { %2685 = sst [smem:[#allocation35_spill]] %s2665_s1 }
   0x3   :  { %2686 = sst [smem:[#allocation36_spill]] %s2666_s2 }
   0x4   :  { %2687 = sst [smem:[#allocation37_spill]] %s2675_s11 }
   0x5   :  { %2688 = sst [smem:[#allocation38_spill]] %s2676_s12 }
   0x6   :  { %18 = vsyncpa [#allocation3], 0 }
   0x7   :  { %20 = vsyncpa [#allocation3 + $0x1], 0 }
   0x8   :  { %21 = vsyncpa [#allocation5], 0 }
   0x9   :  { %22 = vsyncpa [#allocation8], 0 }
   0xa   :  { %23 = vsyncpa [#allocation11], 0 }
   0xb   :  { %24 = vsyncpa [#allocation14], 0 }
   0xc   :  { %25 = vsyncpa [#allocation17], 0 }
   0xd   :  { %26 = vsyncpa [#allocation20], 0 }
   0xe   :  { %27 = vsyncpa [#allocation4], 0 }
   0xf   :  { %29 = vsyncpa [#allocation4 + $0x1], 0 }
  0x10   :  { %30 = vsyncpa [#allocation23], 0 }
  0x11   :  { %32 = vsyncpa [#allocation23 + $0x1], 0  ;;  %s2168_s21 = smov 0   ;;  %s2170_s22 = smov 0  }
  0x12   :  { %s2172_s23 = smov 0   ;;  %s2174_s24 = smov 0  }
  0x13 LB: > { %s2085_s25 = smov [#allocation7]   ;;  %s2189_s27 = sadd.s32 4294967295, %s2083_s24   ;;  %s2083_s24 = sphi %s2174_s24, %s2725_s24   ;;  %s2079_s23 = sphi %s2172_s23, %s2724_s23   ;;  %s2075_s22 = sphi %s2170_s22, %s2723_s22   ;;  %s2071_s21 = sphi %s2168_s21, %s2722_s21  }
  0x14   : > { %s353_s26 = sshll.u32 %s2085_s25, 4  ;;  %p1419_p0 = scmp.ge.s32.totalorder %s2083_s24, 1  ;;  %s2194_s26 = int_to_ptr.vmem [resolvable:$true] %s353_s26 }
  0x15   : > { %p2680_p1 = scmp.eq.s32.totalorder %s2189_s27, 0  ;;  %p331_p2 = scmp.lt.s32.totalorder %s2083_s24, 3 }
  0x16   : > { %s2086_s29 = smov [#allocation10]   ;;  %s2087_s13 = smov [#allocation13]  }
  0x17   : > { %p2196_p3 = pnand %p1419_p0, %p331_p2  ;;  %s375_s30 = sshll.u32 %s2086_s29, 4  ;;  %s2203_s30 = int_to_ptr.vmem [resolvable:$true] %s375_s30 }
  0x18   : > { %s397_s14 = sshll.u32 %s2087_s13, 4  ;;  %s2088_s16 = smov [#allocation16]   ;;  %s2211_s14 = int_to_ptr.vmem [resolvable:$true] %s397_s14 }
  0x19   : > { %s2689_s28 = scalar_select %p2196_p3, 1, 0 }
  0x1a   : > { %p1537_p5 = pneg %p2196_p3  ;;  %s2213_s17 = sshll.u32 %s2088_s16, 4  ;;  %s420_s17 = int_to_ptr.vmem [resolvable:$true] %s2213_s17 }
  0x1b   : > { %2690 = sst [smem:[#allocation33_spill]] %s2689_s28  ;;  %s2692_s2 = sld [smem:[#allocation36_spill]] }
  0x1c   : > { %p2207_p6 = pnand %p1537_p5, %p2680_p1 }
  0x1e   : > { %p2223_p8 = pneg %p2207_p6 }
  0x21   : > { %s1666_s20 = scalar_lea.hbm %s2692_s2, 64 }
  0x22   : > { %p1667_p7 = scmp.ne.s32.totalorder %s2692_s2, %s1666_s20  ;;  %p1673_p11 = scmp.lt.u32.totalorder %s1666_s20, %s2692_s2 }
  0x24   : > { %p1669_p9 = pnand %p2223_p8, %p1667_p7 }
  0x26   : > { %p1670_p10 = pneg %p1669_p9 }
  0x28   : > { %p1675_p12 = pnand %p1673_p11, %p1670_p10 }
  0x2a   : > { %1678 = shalt.err (!%p1675_p12)
}
  0x2b   : > { %s1679_s18 = scalar_lea.vmem %s2194_s26, 64  ;;  %p1687_p5 = scmp.lt.s32.totalorder %s2194_s26, %s2194_s26 }
  0x2c   : > { %p1680_p13 = scmp.ne.s32.totalorder %s2194_s26, %s1679_s18  ;;  %p1688_p4 = scmp.lt.s32.totalorder %s1679_s18, %s1679_s18 }
  0x2e   : > { %p1682_p0 = pnand %p1680_p13, %p2223_p8  ;;  %p1689_p7 = por %p1688_p4, %p1687_p5 }
  0x30   : > { %p1683_p2 = pneg %p1682_p0 }
  0x32   : > { %p1690_p9 = pnand %p1689_p7, %p1683_p2 }
  0x34   : > { %1693 = shalt.err (!%p1690_p9)
}
  0x35   : > { %1543 = dma.hbm_to_vmem [thread:$0]  (!%p2207_p6), %s2692_s2, 64, %s2194_s26, [#allocation8]  }
  0x36   : > { %s1694_s29 = scalar_lea.hbm %s2668_s4, 128 }
  0x37   : > { %p1695_p10 = scmp.ne.s32.totalorder %s2668_s4, %s1694_s29  ;;  %p1701_p12 = scmp.lt.u32.totalorder %s1694_s29, %s2668_s4 }
  0x39   : > { %p1697_p4 = pnand %p1695_p10, %p2223_p8 }
  0x3b   : > { %p1698_p11 = pneg %p1697_p4 }
  0x3d   : > { %p1703_p13 = pnand %p1701_p12, %p1698_p11 }
  0x3f   : > { %1706 = shalt.err (!%p1703_p13)
}
  0x40   : > { %s1707_s26 = scalar_lea.vmem %s2203_s30, 128  ;;  %p1715_p7 = scmp.lt.s32.totalorder %s2203_s30, %s2203_s30 }
  0x41   : > { %p1708_p0 = scmp.ne.s32.totalorder %s2203_s30, %s1707_s26  ;;  %p1716_p9 = scmp.lt.s32.totalorder %s1707_s26, %s1707_s26 }
  0x43   : > { %p1710_p2 = pnand %p1708_p0, %p2223_p8  ;;  %p1717_p10 = por %p1716_p9, %p1715_p7 }
  0x45   : > { %p1711_p5 = pneg %p1710_p2 }
  0x47   : > { %p1718_p4 = pnand %p1717_p10, %p1711_p5 }
  0x49   : > { %1721 = shalt.err (!%p1718_p4)
}
  0x4a   : > { %1549 = dma.hbm_to_vmem [thread:$0]  (!%p2207_p6), %s2668_s4, 128, %s2203_s30, [#allocation11]  }
  0x4b   : > { %s1722_s20 = scalar_lea.hbm %s2670_s6, 128 }
  0x4c   : > { %p1723_p11 = scmp.ne.s32.totalorder %s2670_s6, %s1722_s20  ;;  %p1729_p0 = scmp.lt.u32.totalorder %s1722_s20, %s2670_s6 }
  0x4e   : > { %p1725_p12 = pnand %p1723_p11, %p2223_p8 }
  0x50   : > { %p1726_p13 = pneg %p1725_p12 }
  0x52   : > { %p1731_p2 = pnand %p1729_p0, %p1726_p13 }
  0x54   : > { %1734 = shalt.err (!%p1731_p2)
}
  0x55   : > { %s1735_s30 = scalar_lea.vmem %s2211_s14, 128  ;;  %p1743_p10 = scmp.lt.s32.totalorder %s2211_s14, %s2211_s14 }
  0x56   : > { %p1736_p5 = scmp.ne.s32.totalorder %s2211_s14, %s1735_s30  ;;  %p1744_p4 = scmp.lt.s32.totalorder %s1735_s30, %s1735_s30 }
  0x58   : > { %p1738_p7 = pnand %p1736_p5, %p2223_p8  ;;  %p1745_p11 = por %p1744_p4, %p1743_p10 }
  0x5a   : > { %p1739_p9 = pneg %p1738_p7 }
  0x5c   : > { %p1746_p12 = pnand %p1745_p11, %p1739_p9 }
  0x5e   : > { %1749 = shalt.err (!%p1746_p12)
}
  0x5f   : > { %1555 = dma.hbm_to_vmem [thread:$0]  (!%p2207_p6), %s2670_s6, 128, %s2211_s14, [#allocation14]  }
  0x60   : > { %s1750_s19 = scalar_lea.hbm %s2672_s8, 128 }
  0x61   : > { %p1751_p13 = scmp.ne.s32.totalorder %s2672_s8, %s1750_s19  ;;  %p1757_p5 = scmp.lt.u32.totalorder %s1750_s19, %s2672_s8 }
  0x63   : > { %p1753_p0 = pnand %p1751_p13, %p2223_p8 }
  0x65   : > { %p1754_p2 = pneg %p1753_p0 }
  0x67   : > { %p1759_p7 = pnand %p1757_p5, %p1754_p2 }
  0x69   : > { %1762 = shalt.err (!%p1759_p7)
}
  0x6a   : > { %s1763_s18 = scalar_lea.vmem %s420_s17, 128  ;;  %p1771_p11 = scmp.lt.s32.totalorder %s420_s17, %s420_s17 }
  0x6b   : > { %p1764_p9 = scmp.ne.s32.totalorder %s420_s17, %s1763_s18  ;;  %p1772_p12 = scmp.lt.s32.totalorder %s1763_s18, %s1763_s18 }
  0x6d   : > { %p1766_p10 = pnand %p1764_p9, %p2223_p8  ;;  %p1773_p1 = por %p1772_p12, %p1771_p11 }
  0x6f   : > { %p1767_p4 = pneg %p1766_p10 }
  0x71   : > { %p1774_p3 = pnand %p1773_p1, %p1767_p4 }
  0x73   : > { %1777 = shalt.err (!%p1774_p3)
}
  0x74   : > { %1561 = dma.hbm_to_vmem [thread:$0]  (!%p2207_p6), %s2672_s8, 128, %s420_s17, [#allocation17]  }
  0x75   : > { %s2694_s1 = sld [smem:[#allocation35_spill]] }
  0x7b   : > { %s1778_s28 = scalar_lea.hbm %s2694_s1, 16 }
  0x7c   : > { %p1779_p13 = scmp.ne.s32.totalorder %s2694_s1, %s1778_s28  ;;  %p1785_p1 = scmp.lt.u32.totalorder %s1778_s28, %s2694_s1 }
  0x7e   : > { %p1781_p0 = pnand %p1779_p13, %p2223_p8 }
  0x80   : > { %p1782_p2 = pneg %p1781_p0 }
  0x82   : > { %p1787_p3 = pnand %p1785_p1, %p1782_p2 }
  0x84   : > { %1790 = shalt.err (!%p1787_p3)
}
  0x85   : > { %s2089_s29 = smov [#allocation6]   ;;  %s2090_s18 = smov [#allocation9]  }
  0x86   : > { %1540 = dma.hbm_to_smem (!%p2207_p6), %s2694_s1, 16, %s2089_s29, [#allocation5]  }
  0x87   : > { %s364_s14 = sshll.u32 %s2090_s18, 4  ;;  %s2091_s30 = smov [#allocation12]   ;;  %s365_s14 = int_to_ptr.vmem [resolvable:$true] %s364_s14 }
  0x88   : > { %s386_s26 = sshll.u32 %s2091_s30, 4  ;;  %s1791_s19 = scalar_lea.hbm %s2667_s3, 128  ;;  %s387_s26 = int_to_ptr.vmem [resolvable:$true] %s386_s26 }
  0x89   : > { %p1792_p5 = scmp.ne.s32.totalorder %s2667_s3, %s1791_s19  ;;  %p1798_p10 = scmp.lt.u32.totalorder %s1791_s19, %s2667_s3 }
  0x8b   : > { %p1794_p7 = pnand %p1792_p5, %p2223_p8 }
  0x8d   : > { %p1795_p9 = pneg %p1794_p7 }
  0x8f   : > { %p1800_p4 = pnand %p1798_p10, %p1795_p9 }
  0x91   : > { %1803 = shalt.err (!%p1800_p4)
}
  0x92   : > { %s1804_s29 = scalar_lea.vmem %s365_s14, 128  ;;  %p1812_p0 = scmp.lt.s32.totalorder %s365_s14, %s365_s14 }
  0x93   : > { %p1805_p11 = scmp.ne.s32.totalorder %s365_s14, %s1804_s29  ;;  %p1813_p2 = scmp.lt.s32.totalorder %s1804_s29, %s1804_s29 }
  0x95   : > { %p1807_p12 = pnand %p1805_p11, %p2223_p8  ;;  %p1814_p1 = por %p1813_p2, %p1812_p0 }
  0x97   : > { %p1808_p13 = pneg %p1807_p12 }
  0x99   : > { %p1815_p3 = pnand %p1814_p1, %p1808_p13 }
  0x9b   : > { %1818 = shalt.err (!%p1815_p3)
}
  0x9c   : > { %1546 = dma.hbm_to_vmem [thread:$0]  (!%p2207_p6), %s2667_s3, 128, %s365_s14, [#allocation8]  }
  0x9d   : > { %s1819_s11 = scalar_lea.hbm %s2669_s5, 128 }
  0x9e   : > { %p1820_p5 = scmp.ne.s32.totalorder %s2669_s5, %s1819_s11  ;;  %p1826_p10 = scmp.lt.u32.totalorder %s1819_s11, %s2669_s5 }
  0xa0   : > { %p1822_p7 = pnand %p1820_p5, %p2223_p8 }
  0xa2   : > { %p1823_p9 = pneg %p1822_p7 }
  0xa4   : > { %p1828_p4 = pnand %p1826_p10, %p1823_p9 }
  0xa6   : > { %1831 = shalt.err (!%p1828_p4)
}
  0xa7   : > { %s1832_s17 = scalar_lea.vmem %s387_s26, 128  ;;  %p1840_p0 = scmp.lt.s32.totalorder %s387_s26, %s387_s26 }
  0xa8   : > { %p1833_p11 = scmp.ne.s32.totalorder %s387_s26, %s1832_s17  ;;  %p1841_p2 = scmp.lt.s32.totalorder %s1832_s17, %s1832_s17 }
  0xaa   : > { %p1835_p12 = pnand %p1833_p11, %p2223_p8  ;;  %p1842_p1 = por %p1841_p2, %p1840_p0 }
  0xac   : > { %p1836_p13 = pneg %p1835_p12 }
  0xae   : > { %p1843_p3 = pnand %p1842_p1, %p1836_p13 }
  0xb0   : > { %1846 = shalt.err (!%p1843_p3)
}
  0xb1   : > { %1552 = dma.hbm_to_vmem [thread:$0]  (!%p2207_p6), %s2669_s5, 128, %s387_s26, [#allocation11]  }
  0xb2   : > { %s2092_s16 = smov [#allocation15]   ;;  %s2093_s30 = smov [#allocation18]  }
  0xb3   : > { %s408_s18 = sshll.u32 %s2092_s16, 4  ;;  %s430_s12 = sshll.u32 %s2093_s30, 4  ;;  %s409_s18 = int_to_ptr.vmem [resolvable:$true] %s408_s18  ;;  %s431_s12 = int_to_ptr.vmem [resolvable:$true] %s430_s12 }
  0xb4   : > { %s1847_s28 = scalar_lea.hbm %s2671_s7, 64 }
  0xb5   : > { %p1848_p5 = scmp.ne.s32.totalorder %s2671_s7, %s1847_s28  ;;  %p1854_p10 = scmp.lt.u32.totalorder %s1847_s28, %s2671_s7 }
  0xb7   : > { %p1850_p7 = pnand %p1848_p5, %p2223_p8 }
  0xb9   : > { %p1851_p9 = pneg %p1850_p7 }
  0xbb   : > { %p1856_p4 = pnand %p1854_p10, %p1851_p9 }
  0xbd   : > { %1859 = shalt.err (!%p1856_p4)
}
  0xbe   : > { %s1860_s26 = scalar_lea.vmem %s409_s18, 64  ;;  %p1868_p0 = scmp.lt.s32.totalorder %s409_s18, %s409_s18 }
  0xbf   : > { %p1861_p11 = scmp.ne.s32.totalorder %s409_s18, %s1860_s26  ;;  %p1869_p2 = scmp.lt.s32.totalorder %s1860_s26, %s1860_s26 }
  0xc1   : > { %p1863_p12 = pnand %p1861_p11, %p2223_p8  ;;  %p1870_p1 = por %p1869_p2, %p1868_p0 }
  0xc3   : > { %p1864_p13 = pneg %p1863_p12 }
  0xc5   : > { %p1871_p3 = pnand %p1870_p1, %p1864_p13 }
  0xc7   : > { %1874 = shalt.err (!%p1871_p3)
}
  0xc8   : > { %1558 = dma.hbm_to_vmem [thread:$0]  (!%p2207_p6), %s2671_s7, 64, %s409_s18, [#allocation14]  }
  0xc9   : > { %s1875_s19 = scalar_lea.hbm %s2673_s9, 128 }
  0xca   : > { %p1876_p5 = scmp.ne.s32.totalorder %s2673_s9, %s1875_s19  ;;  %p1882_p10 = scmp.lt.u32.totalorder %s1875_s19, %s2673_s9 }
  0xcc   : > { %p1878_p7 = pnand %p1876_p5, %p2223_p8 }
  0xce   : > { %p1879_p9 = pneg %p1878_p7 }
  0xd0   : > { %p1884_p4 = pnand %p1882_p10, %p1879_p9 }
  0xd2   : > { %1887 = shalt.err (!%p1884_p4)
}
  0xd3   : > { %s1888_s14 = scalar_lea.vmem %s431_s12, 128  ;;  %p1896_p0 = scmp.lt.s32.totalorder %s431_s12, %s431_s12 }
  0xd4   : > { %p1889_p11 = scmp.ne.s32.totalorder %s431_s12, %s1888_s14  ;;  %p1897_p2 = scmp.lt.s32.totalorder %s1888_s14, %s1888_s14 }
  0xd6   : > { %p1891_p12 = pnand %p1889_p11, %p2223_p8  ;;  %p1898_p1 = por %p1897_p2, %p1896_p0 }
  0xd8   : > { %p1892_p13 = pneg %p1891_p12 }
  0xda   : > { %p1899_p3 = pnand %p1898_p1, %p1892_p13 }
  0xdc   : > { %1902 = shalt.err (!%p1899_p3)
}
  0xdd   : > { %1564 = dma.hbm_to_vmem [thread:$0]  (!%p2207_p6), %s2673_s9, 128, %s431_s12, [#allocation17]  }
  0xde   : > { %s2094_s29 = smov [#allocation19]   ;;  %s1903_s19 = scalar_lea.hbm %s2674_s10, 128 }
  0xdf   : > { %s441_s16 = sshll.u32 %s2094_s29, 4  ;;  %p1904_p5 = scmp.ne.s32.totalorder %s2674_s10, %s1903_s19  ;;  %s442_s16 = int_to_ptr.vmem [resolvable:$true] %s441_s16 }
  0xe0   : > { %p1910_p10 = scmp.lt.u32.totalorder %s1903_s19, %s2674_s10 }
  0xe1   : > { %p1906_p7 = pnand %p1904_p5, %p2223_p8 }
  0xe3   : > { %p1907_p9 = pneg %p1906_p7 }
  0xe5   : > { %p1912_p4 = pnand %p1910_p10, %p1907_p9 }
  0xe7   : > { %1915 = shalt.err (!%p1912_p4)
}
  0xe8   : > { %s1916_s12 = scalar_lea.vmem %s442_s16, 128  ;;  %p1924_p0 = scmp.lt.s32.totalorder %s442_s16, %s442_s16 }
  0xe9   : > { %p1917_p11 = scmp.ne.s32.totalorder %s442_s16, %s1916_s12  ;;  %p1925_p2 = scmp.lt.s32.totalorder %s1916_s12, %s1916_s12 }
  0xeb   : > { %p1919_p12 = pnand %p1917_p11, %p2223_p8  ;;  %p1926_p1 = por %p1925_p2, %p1924_p0 }
  0xed   : > { %p1920_p13 = pneg %p1919_p12 }
  0xef   : > { %p1927_p3 = pnand %p1926_p1, %p1920_p13 }
  0xf1   : > { %1930 = shalt.err (!%p1927_p3)
}
  0xf2   : > { %1567 = dma.hbm_to_vmem [thread:$0]  (!%p2207_p6), %s2674_s10, 128, %s442_s16, [#allocation20]  }
  0xf3   : > { %s1418_s13 = sadd.s32 4294967294, %s2083_s24   ;;  %s2417_s15 = sadd.s32 1, %s2083_s24  }
  0xf4   : > { %s42_s26 = ssub.s32 %s2083_s24, %s2417_s15  ;;  %s45_s29 = sadd.s32 1, %s2079_s23 }
  0xf5   : > { %p43_p8 = scmp.eq.s32.totalorder %s42_s26, 0  ;;  %p52_p5 = scmp.ne.s32.totalorder %s2079_s23, %s2075_s22 }
  0xf6   : > { %p53_p7 = scmp.eq.s32.totalorder %s2083_s24, 0  ;;  %p58_p9 = scmp.ne.s32.totalorder %s2075_s22, %s2071_s21 }
  0xf7   : > { %s2428_s30 = scalar_select %p43_p8, %s2079_s23, %s45_s29  }
  0xf8   : > { %p2430_p10 = por %p53_p7, %p52_p5  ;;  %p2696_p4 = scmp.eq.s32.totalorder %s2189_s27, 0 }
  0xf9   : > { %p292_p11 = scmp.eq.s32.totalorder %s2189_s27, 1  ;;  %p298_p12 = scmp.eq.s32.totalorder %s1418_s13, 1 }
  0xfa   : > { %p2436_p6 = por %p2696_p4, %p58_p9  ;;  %p1589_p13 = scmp.lt.s32.totalorder %s2083_s24, 2 }
  0xfb   : > { %s452_s19 = sand.u32 1, %s2079_s23   ;;  %p2443_p0 = por %p292_p11, %p52_p5 }
  0xfc   : > { %p2447_p2 = por %p298_p12, %p58_p9  ;;  %s1431_s25 = sshll.u32 %s452_s19, 4 }
  0xfd   : > { %s2698_s28 = scalar_select %p2443_p0, 1, 0 }
  0xfe   : > { %s2699_s20 = scalar_select %p2447_p2, 1, 0 }
  0xff   : > { %s1474_s17 = sshll.u32 %s2083_s24, 8  ;;  %s2700_s0 = sld [smem:[#allocation34_spill]] }
 0x100   : > { %s456_s13 = scalar_lea.vmem [#allocation2], %s1431_s25  ;;  %p2461_p1 = pnand %p1589_p13, %p2430_p10 }
 0x101   : > { %s463_s26 = sshll.u32 %s456_s13, 4  ;;  %s2465_s1 = scalar_lea.sflag [#allocation3], %s452_s19  ;;  %s2457_s26 = int_to_ptr.vmem [resolvable:$true] %s463_s26 }
 0x102   : > { %p1933_p8 = pneg %p2461_p1 }
 0x105   : > { %s2455_s18 = scalar_lea.hbm %s2700_s0, %s1474_s17  ;;  %s1936_s11 = scalar_lea.hbm %s2700_s0, 512 }
 0x106   : > { %s1931_s12 = scalar_lea.hbm %s2455_s18, 256  ;;  %p1937_p9 = scmp.lt.u32.totalorder %s2455_s18, %s2700_s0 }
 0x107   : > { %p1932_p3 = scmp.ne.s32.totalorder %s2455_s18, %s1931_s12  ;;  %p1938_p10 = scmp.lt.u32.totalorder %s1936_s11, %s1931_s12 }
 0x108   : > { %p1940_p11 = scmp.lt.u32.totalorder %s1931_s12, %s2455_s18 }
 0x109   : > { %p1934_p5 = pnand %p1933_p8, %p1932_p3  ;;  %p1939_p4 = por %p1938_p10, %p1937_p9 }
 0x10b   : > { %p1935_p7 = pneg %p1934_p5  ;;  %p1941_p12 = por %p1940_p11, %p1939_p4 }
 0x10d   : > { %p1942_p13 = pnand %p1941_p12, %p1935_p7 }
 0x10f   : > { %1945 = shalt.err (!%p1942_p13)
}
 0x110   : > { %s1946_s19 = scalar_lea.vmem %s2457_s26, 256  ;;  %s2095_s25 = smov [#allocation2]  }
 0x111   : > { %p1947_p3 = scmp.ne.s32.totalorder %s2457_s26, %s1946_s19  ;;  %s1951_s17 = sshll.u32 %s2095_s25, 4  ;;  %s1952_s17 = int_to_ptr.vmem [resolvable:$false] %s1951_s17 }
 0x112   : > { %s1953_s14 = scalar_lea.vmem %s1952_s17, 512  ;;  %p1954_p0 = scmp.lt.s32.totalorder %s2457_s26, %s1952_s17 }
 0x113   : > { %p1949_p5 = pnand %p1947_p3, %p1933_p8  ;;  %p1955_p9 = scmp.lt.s32.totalorder %s1953_s14, %s1946_s19 }
 0x115   : > { %p1950_p2 = pneg %p1949_p5  ;;  %p1956_p10 = por %p1955_p9, %p1954_p0 }
 0x117   : > { %p1957_p4 = pnand %p1956_p10, %p1950_p2 }
 0x119   : > { %1960 = shalt.err (!%p1957_p4)
}
 0x11a   : > { %s2096_s12 = smov 128   ;;  %s2097_s11 = smov 8  }
 0x11b   : > { %1571 = dma.hbm_to_vmem [thread:$0]  (!%p2461_p1), %s2455_s18, 256, %s2457_s26, %s2465_s1, %s2096_s12, %s2096_s12, %s2097_s11  }
 0x11c   : > { %s2702_s13 = sld [smem:[#allocation33_spill]] }
 0x122   : > { %p2703_p8 = scmp.ne.s32.totalorder %s2702_s13, 0 }
 0x123   : > { %s2496_s25 = sand.u32 (!%p2703_p8), 1, %s2075_s22  }
 0x124   : > { %475 = sbr.rel (%p2703_p8) target bundleno = 2514 (0x9d2), region = 64  ;;  %s1435_s19 = sshll.u32 (!%p2703_p8), %s2496_s25, 4 }
 0x125   : > { %s478_s17 = scalar_lea.sflag (!%p2703_p8), [#allocation3], %s2496_s25  ;;  %s481_s14 = scalar_lea.vmem (!%p2703_p8), [#allocation2], %s1435_s19 }
 0x12b   : > { %2034 = dma.done.wait (%p2436_p6), %s478_s17, 256  }
 0x12c   : > { %2036 = vsyncadd (%p2436_p6), %s478_s17, 4294967040  ;;  %p2704_p0 = scmp.eq.s32.totalorder %s2189_s27, 0 }
 0x12e   : > { %2038 = dma.done.wait (%p2704_p0), [#allocation5], 16   ;;  %p2705_p2 = pmov %p2704_p0 }
 0x12f   : > { %p2706_p1 = pmov %p2704_p0 }
 0x130   : > { %2040 = vsyncadd (%p2705_p2), [#allocation5], 4294967280 }
 0x131   : > { %2042 = dma.done.wait (%p2706_p1), [#allocation8], 192   ;;  %p2707_p7 = pmov %p2704_p0 }
 0x132   : > { %p2708_p11 = pmov %p2704_p0 }
 0x133   : > { %2044 = vsyncadd (%p2707_p7), [#allocation8], 4294967104 }
 0x134   : > { %2046 = dma.done.wait (%p2708_p11), [#allocation11], 256   ;;  %p2709_p12 = pmov %p2704_p0 }
 0x135   : > { %p2710_p6 = pmov %p2704_p0 }
 0x136   : > { %2048 = vsyncadd (%p2709_p12), [#allocation11], 4294967040 }
 0x137   : > { %2050 = dma.done.wait (%p2710_p6), [#allocation14], 192   ;;  %p2711_p13 = pmov %p2704_p0 }
 0x138   : > { %p2712_p3 = pmov %p2704_p0 }
 0x139   : > { %2052 = vsyncadd (%p2711_p13), [#allocation14], 4294967104 }
 0x13a   : > { %2054 = dma.done.wait (%p2712_p3), [#allocation17], 256   ;;  %p2713_p5 = pmov %p2704_p0 }
 0x13b   : > { %p2714_p9 = pmov %p2704_p0 }
 0x13c   : > { %2056 = vsyncadd (%p2713_p5), [#allocation17], 4294967040 }
 0x13d   : > { %2058 = dma.done.wait (%p2714_p9), [#allocation20], 128   ;;  %p2715_p10 = pmov %p2704_p0 }
 0x13f   : > { %2060 = vsyncadd (%p2715_p10), [#allocation20], 4294967168 }
 0x140   : > { %526 = sfence }
 0x141   : > { %v2528_v0 = vld [vmem:[%s481_s14] sm:$0xff]  ;;  %v2534_v3 = vld [vmem:[%s481_s14 + $0x8] sm:$0xff]  ;;  %vm621_vm0 = vcmask 64512   ;;  %vm641_vm1 = vcmask 1043456   ;;  %v2098_v25 = vmov 0   ;;  %s573_s1 = sld [smem:[#allocation6]] }
 0x142   : > { %v1449_v1 = vcombine.high %v2528_v0, %v2528_v0  ;;  %v1448_v2 = vcombine.low %v2528_v0, %v2528_v0  ;;  %v2538_v4 = vcombine.high %v2534_v3, %v2534_v3  ;;  %v2542_v5 = vcombine.low %v2534_v3, %v2534_v3  ;;  %680 = vmatprep.mubr.bf16.mxu1 %v2098_v25  ;;  %v570_v38 = vld [vmem:[#allocation9] sm:$0xff]  ;;  %v571_v39 = vld [vmem:[#allocation10] sm:$0xff]  ;;  %v569_v54 = vld [vmem:[#allocation7] sm:$0xf]  ;;  %s1454_s16 = sld [smem:[#allocation6 + $0x1]]  ;;  %s1446_s18 = sshll.u32 %s2496_s25, 3 }
 0x143   : > { %1648 = vset.pattern.permute.xlu0 %v2098_v25  ;;  %1649 = vset.pattern.permute.xlu1 %v2098_v25  ;;  %v692_v41 = vunpack.c.l.bf16 %v2528_v0  ;;  %v693_v43 = vunpack.c.h.bf16 %v2528_v0  ;;  %vm2100_vm2 = vmmov 0   ;;  %s2683_s26 = sshll.u32 %s2189_s27, 7  ;;  %vm1183_vm3 = vcmask 7168   ;;  %s567_s29 = scalar_lea.vmem [#allocation22], %s1446_s18 }
 0x144   : > { %581 = vmatprep.subr.bf16.mxu0 %v1449_v1  ;;  %613 = vmatprep.mubr.bf16.mxu0 %v1449_v1  ;;  %v643_v24 = vsel %vm641_vm1, %v1448_v2, 0  ;;  %v833_v55 = vsel %vm641_vm1, %v2542_v5, 0  ;;  %s2716_s13 = sld [smem:[#allocation38_spill]]  ;;  %s1218_s17 = sshll.u32 %s567_s29, 4  ;;  %s1219_s17 = int_to_ptr.vmem [resolvable:$true] %s1218_s17 }
 0x145   : > { %582 = vmatpush1.bf16.xpose.msra.mxu0 %v1448_v2  ;;  %1450 = vmatprep.subr.msk.bf16.mxu1 %vm641_vm1, %v1449_v1  ;;  %v882_v1 = vunpack.c.l.bf16 %v2534_v3  ;;  %s1191_s14 = scalar_lea.sflag [#allocation23], %s2496_s25  ;;  %p2717_p8 = scmp.ne.s32.totalorder %s2698_s28, 0 }
 0x146   : > { %773 = vmatprep.subr.bf16.mxu0 %v2538_v4  ;;  %649 = vmatpush1.bf16.msra.mxu1 %v643_v24 }
 0x147   : > { %v689_v40 = vstv %s573_s1  ;;  %s1961_s1 = scalar_lea.vmem %s1219_s17, 128 }
 0x148   : > { %v879_v0 = vstv %s1454_s16  ;;  %p1962_p4 = scmp.ne.s32.totalorder %s1219_s17, %s1961_s1  ;;  %s2101_s16 = smov [#allocation22]  }
 0x149   : > { %s1965_s0 = sshll.u32 %s2101_s16, 4  ;;  %s1966_s0 = int_to_ptr.vmem [resolvable:$false] %s1965_s0 }
 0x14a   : > { %s2593_s19 = scalar_lea.hbm %s2716_s13, %s2683_s26  ;;  %p1963_p0 = pnand %p1962_p4, %p2717_p8 }
 0x14b   : > { %s1967_s2 = scalar_lea.vmem %s1966_s0, 256  ;;  %p1968_p1 = scmp.lt.s32.totalorder %s1219_s17, %s1966_s0 }
 0x14c   : > { %614 = vmatmul.mubr.bf16.vlgmr.msra.gmra.mrb[0].mxu0 %v1448_v2  ;;  %p1964_p2 = pneg %p1963_p0  ;;  %p1969_p7 = scmp.lt.s32.totalorder %s1967_s2, %s1961_s1 }
 0x14d   : > { %805 = vmatprep.mubr.bf16.mxu0 %v2538_v4  ;;  %774 = vmatpush1.bf16.xpose.msra.mxu0 %v2542_v5 }
 0x14e   : > { %p1970_p11 = por %p1969_p7, %p1968_p1 }
 0x150   : > { %p1971_p12 = pnand %p1970_p11, %p1964_p2 }
 0x154   : > { %806 = vmatmul.mubr.bf16.vlgmr.msra.gmra.mrb[4].mxu0 %v2542_v5 }
 0x155   : > { %926 = vmatprep.mubr.bf16.mxu0 %v2098_v25 }
 0x21f   : > { %v615_v6 = vpop.f32.mrb[0].mxu0 }
 0x220   : > { %v617_v7 = vpop.f32.mrb[1].mxu0  ;;  %v622_v8 = vsel %vm621_vm0, %v615_v6, -inf }
 0x221   : > { %623 = vmax.xlane.f32.xlu0 %v622_v8  ;;  %v618_v9 = vpop.f32.mrb[2].mxu0 }
 0x222   : > { %v619_v10 = vpop.f32.mrb[3].mxu0 }
 0x227   : > { %v807_v14 = vpop.f32.mrb[4].mxu0 }
 0x228   : > { %v809_v15 = vpop.f32.mrb[5].mxu0  ;;  %v813_v23 = vsel %vm621_vm0, %v807_v14, -inf }
 0x229   : > { %v810_v16 = vpop.f32.mrb[6].mxu0 }
 0x22a   : > { %v811_v17 = vpop.f32.mrb[7].mxu0 }
 0x2ae   : > { %v624_v11 = vpop.xlane.xlu0 %623 }
 0x2af   : > { %v625_v12 = vsub.f32 %v624_v11, %v615_v6 }
 0x2b1   : > { %v626_v13 = vsel %vm621_vm0, %v625_v12, -inf }
 0x2b2   : > { %627 = vmax.xlane.f32.xlu0 %v626_v13 }
 0x33f   : > { %v628_v18 = vpop.xlane.xlu0 %627 }
 0x340   : > { %v629_v19 = vsub.f32 %v625_v12, %v628_v18 }
 0x342   : > { %v630_v20 = vmul.f32 1.442695, %v629_v19 }
 0x344   : > { %1654 = vpow2.f32 %v630_v20 }
 0x34e   : > { %v1655_v21 = vpop.eup %1654 }
 0x34f   : > { %v632_v22 = vsel %vm621_vm0, %v1655_v21, 0.0 }
 0x350   : > { %633 = vadd.xlane.f32.xlu1 %v632_v22 }
 0x354   : > { %814 = vmax.xlane.f32.xlu1 %v813_v23 }
 0x3dd   : > { %v634_v26 = vpop.xlane.xlu1 %633 }
 0x3de   : > { %1656 = vrcp.f32 %v634_v26 }
 0x3e1   : > { %v815_v27 = vpop.xlane.xlu1 %814 }
 0x3e2   : > { %v816_v28 = vsub.f32 %v815_v27, %v807_v14 }
 0x3e4   : > { %v817_v29 = vsel %vm621_vm0, %v816_v28, -inf }
 0x3e5   : > { %818 = vmax.xlane.f32.xlu0 %v817_v29 }
 0x3e8   : > { %v1657_v30 = vpop.eup %1656 }
 0x3e9   : > { %v636_v31 = vmul.f32 %v1657_v30, %v1655_v21 }
 0x3eb   : > { %v637_v32 = vpack.c.bf16 %v636_v31, %v636_v31 }
 0x3ed   : > { %1451 = vmatmul.mubr.msk.bf16.vlgmr.msra.gmra.mrb[0].mxu1 %vm621_vm0, %v637_v32 }
 0x3ee   : > { %739 = vmatprep.mubr.bf16.mxu1 %v2098_v25 }
 0x3fb   : > { %750 = vperm.xlu0 %1648, %v570_v38   ;;  %v948_v38 = vld [vmem:[#allocation12] sm:$0xff] }
 0x472   : > { %v819_v33 = vpop.xlane.xlu0 %818 }
 0x473   : > { %v820_v34 = vsub.f32 %v816_v28, %v819_v33 }
 0x475   : > { %v821_v35 = vmul.f32 1.442695, %v820_v34 }
 0x477   : > { %1658 = vpow2.f32 %v821_v35  ;;  %v2099_v35 = vmov 0.0  }
 0x47a   : > { %v751_v15 = vpop.permute.xlu0 %750 }
 0x481   : > { %v1659_v36 = vpop.eup %1658 }
 0x482   : > { %v823_v37 = vsel %vm621_vm0, %v1659_v36, 0.0 }
 0x483   : > { %824 = vadd.xlane.f32.xlu1 %v823_v37 }
 0x494   : > { %757 = vperm.xlu1 %1649, %v571_v39   ;;  %v949_v39 = vld [vmem:[#allocation13] sm:$0xff] }
 0x4c0   : > { %v682_v42 = vpop.f32.mrb[0].mxu1 }
 0x4c1   : > { %v690_v44 = vmul.f32 %v689_v40, %v682_v42  ;;  %v684_v45 = vpop.f32.mrb[1].mxu1 }
 0x4c2   : > { %v691_v46 = vmul.f32 %v689_v40, %v684_v45  ;;  %v686_v47 = vpop.f32.mrb[2].mxu1 }
 0x4c3   : > { %v694_v48 = vadd.f32 %v692_v41, %v690_v44  ;;  %v687_v49 = vpop.f32.mrb[3].mxu1  ;;  %v1043_v47 = vld [vmem:[#allocation16] sm:$0xff] }
 0x4c4   : > { %v695_v50 = vadd.f32 %v693_v43, %v691_v46 }
 0x4c5   : > { %v696_v51 = vpack.c.bf16 %v694_v48, %v694_v48  ;;  %v1108_v48 = vld [vmem:[#allocation18] sm:$0xff] }
 0x4c6   : > { %v697_v52 = vpack.c.bf16 %v695_v50, %v695_v50 }
 0x4c7   : > { %v702_v53 = vsel %vm641_vm1, %v696_v51, 0 }
 0x4c8   : > { %1452 = vmatprep.subr.msk.bf16.mxu1 %vm641_vm1, %v697_v52 }
 0x4c9   : > { %708 = vmatpush1.bf16.msra.mxu1 %v702_v53 }
 0x4ca   : > { %1457 = vmatprep.subr.msk.bf16.mxu1 %vm641_vm1, %v2538_v4  ;;  %v883_v4 = vunpack.c.h.bf16 %v2534_v3 }
 0x4cc   : > { %1453 = vmatmul.mubr.msk.bf16.vlgmr.msra.gmra.mrb[4].mxu1 %vm621_vm0, %v569_v54 }
 0x4cd   : > { %839 = vmatpush1.bf16.msra.mxu1 %v833_v55  ;;  %870 = vmatprep.mubr.bf16.mxu1 %v2098_v25 }
 0x4ce   : > { %1481 = vmatprep.subr.mxu1 %v2099_v35 }
 0x510   : > { %v825_v56 = vpop.xlane.xlu1 %824 }
 0x511   : > { %1660 = vrcp.f32 %v825_v56 }
 0x514   : > { %v758_v17 = vpop.permute.xlu1 %757 }
 0x51b   : > { %v1661_v57 = vpop.eup %1660 }
 0x51c   : > { %v827_v58 = vmul.f32 %v1661_v57, %v1659_v36 }
 0x51e   : > { %v828_v59 = vpack.c.bf16 %v827_v58, %v827_v58 }
 0x520   : > { %1458 = vmatmul.mubr.msk.bf16.vlgmr.msra.gmra.mrb[8].mxu1 %vm621_vm0, %v828_v59  ;;  %v1040_v59 = vld [vmem:[#allocation15] sm:$0xf] }
 0x521   : > { %1483 = vmatprep.mubr.msk.f32.mxu1 %vm2100_vm2, %v2099_v35 }
 0x59f   : > { %v741_v60 = vpop.f32.mrb[4].mxu1 }
 0x5a0   : > { %v743_v61 = vpop.f32.mrb[5].mxu1  ;;  %v753_v3 = vmul.f32 %v751_v15, %v741_v60 }
 0x5a1   : > { %v745_v62 = vpop.f32.mrb[6].mxu1  ;;  %v754_v16 = vmul.f32 %v751_v15, %v743_v61  ;;  %v1109_v61 = vld [vmem:[#allocation19] sm:$0xff] }
 0x5a2   : > { %v746_v63 = vpop.f32.mrb[7].mxu1  ;;  %v760_v19 = vadd.f32 %v758_v17, %v753_v3 }
 0x5a3   : > { %v761_v22 = vadd.f32 %v758_v17, %v754_v16 }
 0x5a4   : > { %v762_v29 = vmax.f32 %v760_v19, 0.0 }
 0x5a5   : > { %v763_v31 = vmax.f32 %v761_v22, 0.0 }
 0x5f3   : > { %v872_v2 = vpop.f32.mrb[8].mxu1 }
 0x5f4   : > { %v880_v5 = vmul.f32 %v879_v0, %v872_v2  ;;  %v874_v6 = vpop.f32.mrb[9].mxu1 }
 0x5f5   : > { %v881_v7 = vmul.f32 %v879_v0, %v874_v6  ;;  %v876_v8 = vpop.f32.mrb[10].mxu1 }
 0x5f6   : > { %v884_v9 = vadd.f32 %v882_v1, %v880_v5  ;;  %v877_v10 = vpop.f32.mrb[11].mxu1 }
 0x5f7   : > { %v885_v11 = vadd.f32 %v883_v4, %v881_v7 }
 0x5f8   : > { %v886_v12 = vpack.c.bf16 %v884_v9, %v884_v9 }
 0x5f9   : > { %v887_v13 = vpack.c.bf16 %v885_v11, %v885_v11 }
 0x5fa   : > { %v889_v14 = vsel %vm641_vm1, %v886_v12, 0 }
 0x5fb   : > { %1459 = vmatprep.subr.msk.bf16.mxu0 %vm641_vm1, %v887_v13 }
 0x5fc   : > { %895 = vmatpush1.bf16.msra.mxu0 %v889_v14 }
 0x5ff   : > { %1460 = vmatmul.mubr.msk.bf16.vlgmr.msra.gmra.mrb[8].mxu0 %vm621_vm0, %v569_v54 }
 0x600   : > { %1090 = vmatprep.mubr.bf16.mxu0 %v2098_v25 }
 0x6d2   : > { %v928_v18 = vpop.f32.mrb[8].mxu0 }
 0x6d3   : > { %v935_v20 = vmul.f32 %v928_v18, %v751_v15  ;;  %v930_v21 = vpop.f32.mrb[9].mxu0 }
 0x6d4   : > { %v936_v23 = vmul.f32 %v930_v21, %v751_v15  ;;  %v932_v24 = vpop.f32.mrb[10].mxu0 }
 0x6d5   : > { %v937_v26 = vadd.f32 %v935_v20, %v758_v17  ;;  %v933_v27 = vpop.f32.mrb[11].mxu0 }
 0x6d6   : > { %v938_v28 = vadd.f32 %v936_v23, %v758_v17 }
 0x6d7   : > { %v939_v30 = vmax.f32 %v937_v26, 0.0 }
 0x6d8   : > { %v940_v32 = vmax.f32 %v938_v28, 0.0 }
 0x6d9   : > { %v941_v33 = vadd.f32 %v939_v30, %v762_v29 }
 0x6da   : > { %v942_v25 = vadd.f32 %v940_v32, %v763_v31 }
 0x6dc   : > { %v943_v34 = vadd.f32 %v942_v25, %v941_v33 }
 0x6de   : > { %944 = vadd.xlane.f32.xlu1 %v943_v34 }
 0x76b   : > { %v945_v36 = vpop.xlane.xlu1 %944 }
 0x76c   : > { %v947_v37 = vmul.f32 0.00390625, %v945_v36 }
 0x76e   : > { %1482 = vmatpush3.msra.mxu1 %v947_v37 }
 0x76f   : > { %1484 = vmatmul.mubr.msk.f32.vlgmr.msra.gmra.mrb[12].mxu1 %vm621_vm0, %v948_v38  ;;  %1486 = vmatprep.subr.mxu1 %v2099_v35 }
 0x770   : > { %1487 = vmatpush3.msra.mxu1 %v947_v37  ;;  %1488 = vmatprep.mubr.msk.f32.mxu1 %vm2100_vm2, %v2099_v35 }
 0x773   : > { %1489 = vmatmul.mubr.msk.f32.vlgmr.msra.gmra.mrb[14].mxu1 %vm621_vm0, %v1108_v48 }
 0x842   : > { %v1019_v40 = vpop.f32.mrb[12].mxu1 }
 0x843   : > { %v1020_v41 = vadd.f32 %v1019_v40, %v949_v39  ;;  %v1485_v42 = vpop.f32.mrb[13].mxu1 }
 0x845   : > { %v1462_v43 = vmul.f32 -1.442695, %v1020_v41 }
 0x846   : > { %v1179_v60 = vpop.f32.mrb[14].mxu1 }
 0x847   : > { %1662 = vpow2.f32 %v1462_v43  ;;  %v1490_v62 = vpop.f32.mrb[15].mxu1  ;;  %v1180_v63 = vadd.f32 %v1179_v60, %v1109_v61 }
 0x849   : > { %1184 = vst.msk [vmem:[%s567_s29] sm:$0xff] %vm1183_vm3, %v1180_v63 }
 0x851   : > { %v1663_v44 = vpop.eup %1662 }
 0x852   : > { %v1026_v45 = vadd.f32 1.0, %v1663_v44 }
 0x854   : > { %1664 = vrcp.f32 %v1026_v45 }
 0x85e   : > { %v1665_v46 = vpop.eup %1664 }
 0x85f   : > { %1031 = vperm.xlu0 %1648, %v1665_v46  }
 0x863   : > { %1046 = vperm.xlu0 %1648, %v1043_v47  }
 0x8de   : > { %v1032_v49 = vpop.permute.xlu0 %1031 }
 0x8df   : > { %v1034_v50 = vmul.f32 %v1032_v49, %v941_v33  ;;  %v1035_v51 = vmul.f32 %v1032_v49, %v942_v25 }
 0x8e1   : > { %v1036_v52 = vadd.f32 %v1034_v50, %v941_v33  ;;  %v1037_v53 = vadd.f32 %v1035_v51, %v942_v25 }
 0x8e3   : > { %v1038_v54 = vmax.f32 %v1036_v52, 0.0  ;;  %v1039_v55 = vmax.f32 %v1037_v53, 0.0 }
 0x8e5   : > { %v1041_v56 = vpack.c.bf16 %v1038_v54, %v1038_v54  ;;  %v1042_v57 = vpack.c.bf16 %v1039_v55, %v1039_v55 }
 0x8e7   : > { %1463 = vmatprep.subr.msk.bf16.mxu0 %vm641_vm1, %v1042_v57  ;;  %v1053_v58 = vsel %vm641_vm1, %v1041_v56, 0 }
 0x8e8   : > { %1059 = vmatpush1.bf16.msra.mxu0 %v1053_v58 }
 0x8eb   : > { %1464 = vmatmul.mubr.msk.bf16.vlgmr.msra.gmra.mrb[12].mxu0 %vm621_vm0, %v1040_v59 }
 0x8ec   : > { %1974 = shalt.err (!%p1971_p12)
}
 0x8ed   : > { %s1975_s29 = scalar_lea.hbm %s2593_s19, 128  ;;  %s1979_s16 = scalar_lea.hbm %s2716_s13, 256 }
 0x8ee   : > { %p1976_p6 = scmp.ne.s32.totalorder %s2593_s19, %s1975_s29  ;;  %p1980_p5 = scmp.lt.u32.totalorder %s2593_s19, %s2716_s13 }
 0x8ef   : > { %p1981_p9 = scmp.lt.u32.totalorder %s1979_s16, %s1975_s29  ;;  %p1983_p4 = scmp.lt.u32.totalorder %s1975_s29, %s2593_s19 }
 0x8f0   : > { %p1977_p13 = pnand %p1976_p6, %p2717_p8 }
 0x8f1   : > { %p1982_p10 = por %p1981_p9, %p1980_p5 }
 0x8f2   : > { %p1978_p3 = pneg %p1977_p13 }
 0x8f3   : > { %p1984_p0 = por %p1983_p4, %p1982_p10 }
 0x8f5   : > { %p1985_p2 = pnand %p1984_p0, %p1978_p3 }
 0x8f7   : > { %1988 = shalt.err (!%p1985_p2)
}
 0x8f8   : > { %1534 = dma.vmem_to_hbm [thread:$0]  (%p2717_p8), %s1219_s17, 128, %s2593_s19, %s1191_s14   ;;  %v1047_v0 = vpop.permute.xlu0 %1046 }
 0x8f9   : > { %s560_s2 = scalar_lea.vmem [#allocation21], %s1446_s18  ;;  %s2718_s1 = sshll.u32 %s2189_s27, 7 }
 0x8fa   : > { %s1205_s26 = sshll.u32 %s560_s2, 4  ;;  %s2719_s11 = sld [smem:[#allocation37_spill]]  ;;  %s2622_s26 = int_to_ptr.vmem [resolvable:$true] %s1205_s26 }
 0x8fb   : > { %s1186_s19 = scalar_lea.sflag [#allocation4], %s2496_s25  ;;  %s1989_s17 = scalar_lea.vmem %s2622_s26, 128 }
 0x8fc   : > { %p1990_p1 = scmp.ne.s32.totalorder %s2622_s26, %s1989_s17  ;;  %s2102_s18 = smov [#allocation21]  }
 0x8fd   : > { %s1993_s14 = sshll.u32 %s2102_s18, 4  ;;  %s1994_s14 = int_to_ptr.vmem [resolvable:$false] %s1993_s14 }
 0x8fe   : > { %p1991_p7 = pnand %p1990_p1, %p2717_p8  ;;  %s1995_s27 = scalar_lea.vmem %s1994_s14, 256 }
 0x8ff   : > { %p1996_p12 = scmp.lt.s32.totalorder %s2622_s26, %s1994_s14  ;;  %p1997_p6 = scmp.lt.s32.totalorder %s1995_s27, %s1989_s17 }
 0x900   : > { %s2620_s16 = scalar_lea.hbm %s2719_s11, %s2718_s1  ;;  %p1992_p11 = pneg %p1991_p7 }
 0x901   : > { %p1998_p13 = por %p1997_p6, %p1996_p12 }
 0x903   : > { %p1999_p3 = pnand %p1998_p13, %p1992_p11 }
 0x9be   : > { %v1092_v1 = vpop.f32.mrb[12].mxu0 }
 0x9bf   : > { %v1093_v2 = vadd.f32 %v1092_v1, %v1047_v0  ;;  %v1094_v4 = vpop.f32.mrb[13].mxu0 }
 0x9c0   : > { %v1095_v5 = vadd.f32 %v1094_v4, %v1047_v0  ;;  %v1096_v6 = vpop.f32.mrb[14].mxu0 }
 0x9c1   : > { %v1097_v7 = vpop.f32.mrb[15].mxu0 }
 0x9c2   : > { %v1475_v8 = vpack.c.bf16 %v1095_v5, %v1093_v2 }
 0x9c4   : > { %1107 = vst [vmem:[%s560_s2] sm:$0xff] %v1475_v8 }
 0x9c5   : > { %2002 = shalt.err (!%p1999_p3)
}
 0x9c6   : > { %s2003_s25 = scalar_lea.hbm %s2620_s16, 128  ;;  %s2007_s1 = scalar_lea.hbm %s2719_s11, 256 }
 0x9c7   : > { %p2004_p5 = scmp.ne.s32.totalorder %s2620_s16, %s2003_s25  ;;  %p2008_p4 = scmp.lt.u32.totalorder %s2620_s16, %s2719_s11 }
 0x9c8   : > { %p2009_p0 = scmp.lt.u32.totalorder %s2007_s1, %s2003_s25  ;;  %p2011_p1 = scmp.lt.u32.totalorder %s2003_s25, %s2620_s16 }
 0x9c9   : > { %p2005_p9 = pnand %p2004_p5, %p2717_p8 }
 0x9ca   : > { %p2010_p2 = por %p2009_p0, %p2008_p4 }
 0x9cb   : > { %p2006_p10 = pneg %p2005_p9 }
 0x9cc   : > { %p2012_p7 = por %p2011_p1, %p2010_p2 }
 0x9ce   : > { %p2013_p11 = pnand %p2012_p7, %p2006_p10 }
 0x9d0   : > { %2016 = shalt.err (!%p2013_p11)
}
 0x9d1   : > { %1533 = dma.vmem_to_hbm [thread:$0]  (%p2717_p8), %s2622_s26, 128, %s2620_s16, %s1186_s19  }
 0x9d2 PF: > { %s1230_s17 = sand.u32 1, %s2071_s21   ;;  %p2720_p12 = scmp.ne.s32.totalorder %s2699_s20, 0 }
 0x9d3   : > { %p2721_p6 = scmp.ge.s32.totalorder %s2083_s24, 2  ;;  %s1231_s18 = scalar_lea.sflag [#allocation4], %s1230_s17 }
 0x9d5   : > { %p1573_p13 = pnand %p2721_p6, %p2720_p12 }
 0x9d7   : > { %2062 = dma.done.wait (!%p1573_p13), %s1231_s18, 128  }
 0x9d8   : > { %2064 = vsyncadd (!%p1573_p13), %s1231_s18, 4294967168  ;;  %s1240_s14 = scalar_lea.sflag [#allocation23], %s1230_s17 }
 0x9d9   : > { %2066 = dma.done.wait (!%p1573_p13), %s1240_s14, 128  }
 0x9da   : > { %2068 = vsyncadd (!%p1573_p13), %s1240_s14, 4294967168  ;;  %p35_p8 = scmp.ge.s32.totalorder %s2417_s15, 4   ;;  %s2722_s21 = smov %s2075_s22 }
 0x9db   : > { %s2723_s22 = smov %s2079_s23  ;;  %s2724_s23 = smov %s2428_s30 }
 0x9dc   : > { %s2725_s24 = smov %s2417_s15  ;;  %37 = sbr.rel (!%p35_p8) target bundleno = 19 (0x13), region = 167 }
 0x9e3   :  { %1245 = vsyncpa [#allocation3], 1 }
 0x9e4   :  { %1247 = vsyncpa [#allocation3 + $0x1], 1 }
 0x9e5   :  { %1248 = vsyncpa [#allocation8], 1 }
 0x9e6   :  { %1249 = vsyncpa [#allocation11], 1 }
 0x9e7   :  { %1250 = vsyncpa [#allocation14], 1 }
 0x9e8   :  { %1251 = vsyncpa [#allocation17], 1 }
 0x9e9   :  { %1252 = vsyncpa [#allocation20], 1 }
 0x9ea   :  { %1253 = vsyncpa [#allocation4], 1 }
 0x9eb   :  { %1255 = vsyncpa [#allocation4 + $0x1], 1 }
 0x9ec   :  { %1256 = vsyncpa [#allocation23], 1 }
 0x9ed   :  { %1258 = vsyncpa [#allocation23 + $0x1], 1 }
 0x9ee   :  { %1259 = vsyncpa [#allocation5], 1 }
 0x9ef   :  { %1261 = vsyncpa [#allocation5 + $0x1], 1 }

</bundles_post_ra>
